<compile_context>
chip_gen: v6e
topology: v6e:2x2x1
jax: 0.10.0
libtpu: 0.0.40
codegen_flags: <defaults>
</compile_context>

<pallas_src>
import functools

import jax
import jax.numpy as jnp
import numpy as np
from jax.experimental import pallas as pl
from jax.experimental.pallas import tpu as pltpu


def _dkvb_kernel(x_ref, cbt_ref, esq_ref, val_ref, o_ref, *, heads, mp):
    """One grid step == one (batch, seq-tile).

    x_ref   : (1, TN, D)        bf16   input tile
    cbt_ref : (D, H*Mp)         bf16   block-diagonal transposed codebooks
    esq_ref : (1, H*Mp)         f32    ||codebook||^2 (padded entries = +BIG)
    val_ref : (H*Mp, H*Dv)      f32    block-diagonal memory values
    o_ref   : (1, TN, H*Dv)     f32    flattened memories tile
    """
    x = x_ref[0]                                                     # (TN, D)

    # Single fused distance matmul for all heads (block-diagonal RHS).
    dots = jnp.dot(x, cbt_ref[...],
                   preferred_element_type=jnp.float32)               # (TN, H*Mp)
    dist = esq_ref[...] - 2.0 * dots                                 # (TN, H*Mp)

    tn, hmp = dist.shape
    col = jax.lax.broadcasted_iota(jnp.int32, (tn, hmp), 1)

    # Per-head argmin on 128-aligned lane slices; build one fused one-hot.
    onehot = jnp.zeros((tn, hmp), jnp.float32)
    for h in range(heads):                    # static, heads is compile-time small
        d_h = dist[:, h * mp:(h + 1) * mp]                           # (TN, Mp)
        idx = jnp.argmin(d_h, axis=-1, keepdims=True).astype(jnp.int32)  # (TN, 1)
        onehot = onehot + (col == (idx + h * mp)).astype(jnp.float32)

    # Single fused gather-as-matmul; one lane-dense store for the whole tile.
    mem = jnp.dot(onehot, val_ref[...],
                  preferred_element_type=jnp.float32)                # (TN, H*Dv)
    o_ref[0] = mem.astype(o_ref.dtype)


def discrete_kv_bottleneck(x, codebooks, values, *, block_n=None):
    """x: (B, N, D) f32; codebooks: (H, M, D//H); values: (H, M, Dv).

    Returns flattened memories of shape (B, N, H*Dv), f32.
    """
    B, N, D = x.shape
    H, M, Dh = codebooks.shape
    Hv, Mv, Dv = values.shape
    assert D == H * Dh, "embedding dim must equal heads * codebook_dim"
    assert Hv == H and Mv == M

    tn = block_n if block_n is not None else min(512, N)
    assert N % tn == 0 and tn % 8 == 0, "seq tile must divide N and be sublane-aligned"

    # Pad each head's codebook to a multiple of 128 memories so that
    #   (a) the fused H*Mp axis is lane-dense, and
    #   (b) per-head argmin slices are 128-aligned (no relayout copies).
    mp = ((M + 127) // 128) * 128
    hmp = H * mp
    hdv = H * Dv
    big = 1e30  # padded codebook rows get a huge ||e||^2 so they never win argmin

    # bf16 for the distance matmul (MXU native path, f32 accumulation).
    x_q = x.astype(jnp.bfloat16)
    cb_q = codebooks.astype(jnp.bfloat16)

    # Block-diagonal, pre-transposed codebooks: (D, H*Mp), bf16.
    cb_pad = jnp.pad(cb_q, ((0, 0), (0, mp - M), (0, 0)))            # (H, Mp, Dh)
    cbt_bd = jax.scipy.linalg.block_diag(*[cb_pad[h].T for h in range(H)])

    # Precomputed squared norms (grid-invariant), padded entries = +BIG.
    e_sq = jnp.sum(cb_q.astype(jnp.float32) ** 2, axis=-1)           # (H, M)
    e_sq = jnp.pad(e_sq, ((0, 0), (0, mp - M)), constant_values=big)
    e_sq = e_sq.reshape(1, hmp)

    # Block-diagonal values matrix: (H*Mp, H*Dv), f32 (one-hot gather stays exact).
    val_pad = jnp.pad(values.astype(jnp.float32), ((0, 0), (0, mp - M), (0, 0)))
    val_bd = jax.scipy.linalg.block_diag(*[val_pad[h] for h in range(H)])

    kernel = functools.partial(_dkvb_kernel, heads=H, mp=mp)

    # Explicit VMEM budget: double-buffered x/out tiles + (conservatively
    # double-buffered) grid-invariant codebook/values matrices + headroom.
    # Floor at the 32 MiB scoped default, cap well under v7x's 64 MiB physical.
    vmem_bytes = (2 * (tn * D * 2 + tn * hdv * 4)
                  + 2 * (D * hmp * 2 + hmp * 4 + hmp * hdv * 4)
                  + (4 << 20))
    vmem_bytes = int(min(max(vmem_bytes, 32 << 20), 48 << 20))

    out = pl.pallas_call(
        kernel,
        out_shape=jax.ShapeDtypeStruct((B, N, hdv), jnp.float32),
        grid_spec=pltpu.PrefetchScalarGridSpec(
            num_scalar_prefetch=0,
            grid=(B, N // tn),
            in_specs=[
                pl.BlockSpec((1, tn, D), lambda b, n: (b, n, 0)),
                pl.BlockSpec((D, hmp), lambda b, n: (0, 0)),
                pl.BlockSpec((1, hmp), lambda b, n: (0, 0)),
                pl.BlockSpec((hmp, hdv), lambda b, n: (0, 0)),
            ],
            out_specs=pl.BlockSpec((1, tn, hdv), lambda b, n: (b, n, 0)),
        ),
        compiler_params=pltpu.CompilerParams(
            dimension_semantics=("parallel", "parallel"),
            vmem_limit_bytes=vmem_bytes),
    )(x_q, cbt_bd, e_sq, val_bd)
    return out


def _reference(x, codebooks, values):
    """Pure-JAX reference of the same forward pass (same bf16 quantization of the
    distance path as the kernel, so index selection is apples-to-apples)."""
    B, N, D = x.shape
    H, M, Dh = codebooks.shape
    Dv = values.shape[-1]
    x_q = x.astype(jnp.bfloat16)
    cb_q = codebooks.astype(jnp.bfloat16)
    xh = x_q.reshape(B, N, H, Dh)
    dots = jnp.einsum('bnhd,hmd->bnhm', xh, cb_q,
                      preferred_element_type=jnp.float32)            # (B,N,H,M)
    e_sq = jnp.sum(cb_q.astype(jnp.float32) ** 2, axis=-1)           # (H, M)
    dist = e_sq[None, None] - 2.0 * dots                             # (B,N,H,M)
    idx = jnp.argmin(dist, axis=-1)                                  # (B,N,H)
    mem = values.astype(jnp.float32)[jnp.arange(H)[None, None, :], idx]  # (B,N,H,Dv)
    return mem.reshape(B, N, H * Dv)


if __name__ == "__main__":
    # module config (small, synthetic)
    dim = 64
    num_memory_codebooks = 4            # heads
    num_memories = 64                   # codebook size per head
    dim_memory = 32                     # value dim per head (H*Dv = 128, lane-dense)
    batch, seq = 2, 256
    codebook_dim = dim // num_memory_codebooks

    key = jax.random.PRNGKey(0)
    kx, kc, kv = jax.random.split(key, 3)
    x = jax.random.normal(kx, (batch, seq, dim), dtype=jnp.float32)
    codebooks = jax.random.normal(
        kc, (num_memory_codebooks, num_memories, codebook_dim), dtype=jnp.float32)
    # nn.Parameter(torch.randn(h, num_memories, dim_memory))
    values = jax.random.normal(
        kv, (num_memory_codebooks, num_memories, dim_memory), dtype=jnp.float32)

    out = discrete_kv_bottleneck(x, codebooks, values, block_n=128)
    out = jax.block_until_ready(out)

    ref = _reference(x, codebooks, values)
    assert out.shape == (batch, seq, num_memory_codebooks * dim_memory)
    np.testing.assert_allclose(np.asarray(out), np.asarray(ref),
                               rtol=1e-5, atol=1e-5)
    print("KERNEL_OK")
</pallas_src>

<mosaic_0001>
module attributes {stable_mosaic.version = 11 : i64} {
  func.func @_dkvb_kernel(%arg0: i32, %arg1: i32, %arg2: memref<1x128x64xbf16, #tpu.memory_space<vmem>>, %arg3: memref<64x512xbf16, #tpu.memory_space<vmem>>, %arg4: memref<1x512xf32, #tpu.memory_space<vmem>>, %arg5: memref<512x128xf32, #tpu.memory_space<vmem>>, %arg6: memref<1x128x128xf32, #tpu.memory_space<vmem>>) attributes {dimension_semantics = [#tpu.dimension_semantics<parallel>, #tpu.dimension_semantics<parallel>], iteration_bounds = array<i64: 2, 2>, scalar_prefetch = 0 : i64, scratch_operands = 0 : i64, tpu.core_type = #tpu.core_type<tc>, window_params = [{transform_indices = @transform_0, window_bounds = array<i64: 1, 128, 64>}, {pipeline_mode = #tpu.pipeline_mode<synchronous>, transform_indices = @transform_1, window_bounds = array<i64: 64, 512>}, {pipeline_mode = #tpu.pipeline_mode<synchronous>, transform_indices = @transform_2, window_bounds = array<i64: 1, 512>}, {pipeline_mode = #tpu.pipeline_mode<synchronous>, transform_indices = @transform_3, window_bounds = array<i64: 512, 128>}, {transform_indices = @transform_4, window_bounds = array<i64: 1, 128, 128>}]} {
    %c0 = arith.constant 0 : index
    %c0_0 = arith.constant 0 : index
    %c0_1 = arith.constant 0 : index
    %0 = vector.load %arg2[%c0, %c0_0, %c0_1] : memref<1x128x64xbf16, #tpu.memory_space<vmem>>, vector<1x128x64xbf16>
    %1 = vector.shape_cast %0 : vector<1x128x64xbf16> to vector<128x64xbf16>
    %c0_2 = arith.constant 0 : index
    %c0_3 = arith.constant 0 : index
    %2 = vector.load %arg3[%c0_2, %c0_3] : memref<64x512xbf16, #tpu.memory_space<vmem>>, vector<64x512xbf16>
    %cst = arith.constant dense<0.000000e+00> : vector<128x512xf32>
    %3 = tpu.matmul %1, %2, %cst {dimension_numbers = #tpu.dot_dimension_numbers<[1], [0], [0], [1], [0, 0, 1, 1], [], []>} : vector<128x64xbf16>, vector<64x512xbf16>, vector<128x512xf32> -> vector<128x512xf32>
    %c0_4 = arith.constant 0 : index
    %c0_5 = arith.constant 0 : index
    %4 = vector.load %arg4[%c0_4, %c0_5] : memref<1x512xf32, #tpu.memory_space<vmem>>, vector<1x512xf32>
    %cst_6 = arith.constant 2.000000e+00 : f32
    %5 = vector.broadcast %cst_6 : f32 to vector<128x512xf32>
    %6 = arith.mulf %5, %3 : vector<128x512xf32>
    %7 = vector.broadcast %4 : vector<1x512xf32> to vector<128x512xf32>
    %8 = arith.subf %7, %6 : vector<128x512xf32>
    %9 = tpu.iota {dimensions = array<i32: 1>} : vector<128x512xi32>
    %cst_7 = arith.constant 0.000000e+00 : f32
    %10 = vector.broadcast %cst_7 : f32 to vector<128x512xf32>
    %11 = vector.extract_strided_slice %8 {offsets = [0, 0], sizes = [128, 128], strides = [1, 1]} : vector<128x512xf32> to vector<128x128xf32>
    %12 = tpu.reduce_index %11 {axis = 1 : i32, kind = #tpu.reduction_kind<arg_min>} : vector<128x128xf32> -> vector<128xi32>
    %13 = vector.shape_cast %12 : vector<128xi32> to vector<128x1xi32>
    %c0_i32 = arith.constant 0 : i32
    %14 = vector.broadcast %c0_i32 : i32 to vector<128x1xi32>
    %15 = arith.addi %13, %14 : vector<128x1xi32>
    %16 = vector.broadcast %15 : vector<128x1xi32> to vector<128x512xi32>
    %17 = arith.cmpi eq, %9, %16 : vector<128x512xi32>
    %18 = arith.extui %17 : vector<128x512xi1> to vector<128x512xi32>
    %19 = arith.sitofp %18 : vector<128x512xi32> to vector<128x512xf32>
    %20 = arith.addf %10, %19 : vector<128x512xf32>
    %21 = vector.extract_strided_slice %8 {offsets = [0, 128], sizes = [128, 128], strides = [1, 1]} : vector<128x512xf32> to vector<128x128xf32>
    %22 = tpu.reduce_index %21 {axis = 1 : i32, kind = #tpu.reduction_kind<arg_min>} : vector<128x128xf32> -> vector<128xi32>
    %23 = vector.shape_cast %22 : vector<128xi32> to vector<128x1xi32>
    %c128_i32 = arith.constant 128 : i32
    %24 = vector.broadcast %c128_i32 : i32 to vector<128x1xi32>
    %25 = arith.addi %23, %24 : vector<128x1xi32>
    %26 = vector.broadcast %25 : vector<128x1xi32> to vector<128x512xi32>
    %27 = arith.cmpi eq, %9, %26 : vector<128x512xi32>
    %28 = arith.extui %27 : vector<128x512xi1> to vector<128x512xi32>
    %29 = arith.sitofp %28 : vector<128x512xi32> to vector<128x512xf32>
    %30 = arith.addf %20, %29 : vector<128x512xf32>
    %31 = vector.extract_strided_slice %8 {offsets = [0, 256], sizes = [128, 128], strides = [1, 1]} : vector<128x512xf32> to vector<128x128xf32>
    %32 = tpu.reduce_index %31 {axis = 1 : i32, kind = #tpu.reduction_kind<arg_min>} : vector<128x128xf32> -> vector<128xi32>
    %33 = vector.shape_cast %32 : vector<128xi32> to vector<128x1xi32>
    %c256_i32 = arith.constant 256 : i32
    %34 = vector.broadcast %c256_i32 : i32 to vector<128x1xi32>
    %35 = arith.addi %33, %34 : vector<128x1xi32>
    %36 = vector.broadcast %35 : vector<128x1xi32> to vector<128x512xi32>
    %37 = arith.cmpi eq, %9, %36 : vector<128x512xi32>
    %38 = arith.extui %37 : vector<128x512xi1> to vector<128x512xi32>
    %39 = arith.sitofp %38 : vector<128x512xi32> to vector<128x512xf32>
    %40 = arith.addf %30, %39 : vector<128x512xf32>
    %41 = vector.extract_strided_slice %8 {offsets = [0, 384], sizes = [128, 128], strides = [1, 1]} : vector<128x512xf32> to vector<128x128xf32>
    %42 = tpu.reduce_index %41 {axis = 1 : i32, kind = #tpu.reduction_kind<arg_min>} : vector<128x128xf32> -> vector<128xi32>
    %43 = vector.shape_cast %42 : vector<128xi32> to vector<128x1xi32>
    %c384_i32 = arith.constant 384 : i32
    %44 = vector.broadcast %c384_i32 : i32 to vector<128x1xi32>
    %45 = arith.addi %43, %44 : vector<128x1xi32>
    %46 = vector.broadcast %45 : vector<128x1xi32> to vector<128x512xi32>
    %47 = arith.cmpi eq, %9, %46 : vector<128x512xi32>
    %48 = arith.extui %47 : vector<128x512xi1> to vector<128x512xi32>
    %49 = arith.sitofp %48 : vector<128x512xi32> to vector<128x512xf32>
    %50 = arith.addf %40, %49 : vector<128x512xf32>
    %c0_8 = arith.constant 0 : index
    %c0_9 = arith.constant 0 : index
    %51 = vector.load %arg5[%c0_8, %c0_9] : memref<512x128xf32, #tpu.memory_space<vmem>>, vector<512x128xf32>
    %cst_10 = arith.constant dense<0.000000e+00> : vector<128x128xf32>
    %52 = tpu.matmul %50, %51, %cst_10 {dimension_numbers = #tpu.dot_dimension_numbers<[1], [0], [0], [1], [0, 0, 1, 1], [], []>} : vector<128x512xf32>, vector<512x128xf32>, vector<128x128xf32> -> vector<128x128xf32>
    %c0_11 = arith.constant 0 : index
    %c0_12 = arith.constant 0 : index
    %c0_13 = arith.constant 0 : index
    %53 = vector.load %arg6[%c0_11, %c0_12, %c0_13] : memref<1x128x128xf32, #tpu.memory_space<vmem>>, vector<1x128x128xf32>
    %54 = vector.shape_cast %53 : vector<1x128x128xf32> to vector<128x128xf32>
    %55 = vector.shape_cast %52 : vector<128x128xf32> to vector<1x128x128xf32>
    tpu.vector_store %arg6[%c0_11, %c0_12, %c0_13], %55 {strides = array<i32>} : memref<1x128x128xf32, #tpu.memory_space<vmem>>, vector<1x128x128xf32>,
    return
  }
  func.func @transform_0(%arg0: i32, %arg1: i32) -> (i32, i32, i32) {
    %c0_i32 = arith.constant 0 : i32
    %c0_i32_0 = arith.constant 0 : i32
    return %arg0, %arg1, %c0_i32 : i32, i32, i32
  }
  func.func @transform_1(%arg0: i32, %arg1: i32) -> (i32, i32) {
    %c0_i32 = arith.constant 0 : i32
    %c0_i32_0 = arith.constant 0 : i32
    %c0_i32_1 = arith.constant 0 : i32
    return %c0_i32, %c0_i32_0 : i32, i32
  }
  func.func @transform_2(%arg0: i32, %arg1: i32) -> (i32, i32) {
    %c0_i32 = arith.constant 0 : i32
    %c0_i32_0 = arith.constant 0 : i32
    %c0_i32_1 = arith.constant 0 : i32
    return %c0_i32, %c0_i32_0 : i32, i32
  }
  func.func @transform_3(%arg0: i32, %arg1: i32) -> (i32, i32) {
    %c0_i32 = arith.constant 0 : i32
    %c0_i32_0 = arith.constant 0 : i32
    %c0_i32_1 = arith.constant 0 : i32
    return %c0_i32, %c0_i32_0 : i32, i32
  }
  func.func @transform_4(%arg0: i32, %arg1: i32) -> (i32, i32, i32) {
    %c0_i32 = arith.constant 0 : i32
    %c0_i32_0 = arith.constant 0 : i32
    return %arg0, %arg1, %c0_i32 : i32, i32, i32
  }
}

</mosaic_0001>

<bundles_post_ra>
// kernel: tpu_custom_call.1
= control target key start
LH: loop header
LB: loop body
LE: loop exit
PB: predicated region body
PF: predicated region fallthrough
CT: control target
= control target key end

     0   :  { %9 = vsyncpa [#allocation3], 0  ;;  %s4887_s0 = inlined_call_operand.vmem [shape: bf16[2,256,64], index: 0, kind: input, shape index: {}]   ;;  %s4888_s1 = inlined_call_operand.vmem [shape: bf16[64,512], index: 1, kind: input, shape index: {}]   ;;  %s4889_s2 = inlined_call_operand.vmem [shape: f32[1,512], index: 2, kind: input, shape index: {}]   ;;  %s4890_s3 = inlined_call_operand.hbm [shape: f32[512,128], index: 3, kind: input, shape index: {}]   ;;  %s4891_s4 = inlined_call_operand.hbm [shape: f32[2,256,128], index: 4, kind: output, shape index: {}]  }
   0x1   :  { %10 = vsyncpa [#allocation4], 0 }
   0x2   :  { %12 = vsyncpa [#allocation4 + $0x1], 0  ;;  %s3231_s15 = smov 0   ;;  %s3233_s16 = smov 0  }
   0x3   :  { %s3235_s17 = smov 0   ;;  %s3237_s18 = smov 0  }
   0x4   :  { %s3239_s19 = smov 0   ;;  %s3241_s20 = smov 0  }
   0x5   :  { %s3243_s21 = smov 0   ;;  %s3245_s22 = smov 0  }
   0x6 LB: > { %s2481_s23 = sadd.s32 4294967295, %s3196_s22   ;;  %s2482_s24 = sadd.s32 4294967294, %s3196_s22   ;;  %s3196_s22 = sphi %s3245_s22, %s18_s22   ;;  %s3192_s21 = sphi %s3243_s21, %s4903_s21   ;;  %s3188_s20 = sphi %s3241_s20, %s4902_s20   ;;  %s3184_s19 = sphi %s3239_s19, %s4901_s19   ;;  %s3180_s18 = sphi %s3237_s18, %s4900_s18   ;;  %s3176_s17 = sphi %s3235_s17, %s4899_s17   ;;  %s3172_s16 = sphi %s3233_s16, %s4898_s16   ;;  %s3168_s15 = sphi %s3231_s15, %s4897_s15  }
   0x7   : > { %s27_s25 = sadd.s32 1, %s3188_s20  ;;  %s30_s26 = sadd.s32 1, %s3192_s21 }
   0x8   : > { %p28_p0 = scmp.ge.s32.totalorder %s27_s25, 2  ;;  %s130_s27 = sadd.s32 1, %s3176_s17 }
   0x9   : > { %p140_p1 = scmp.ne.s32.totalorder %s3176_s17, %s3172_s16  ;;  %p141_p2 = scmp.eq.s32.totalorder %s2481_s23, 3 }
   0xa   : > { %s4905_s25 = smov (%p28_p0, %s27_s25), 0  ;;  %s4907_s26 = smov (!%p28_p0, %s30_s26), %s3192_s21 }
   0xb   : > { %s126_s28 = ssub.s32 %s3188_s20, %s4905_s25  ;;  %p3283_p3 = por %p141_p2, %p140_p1 }
   0xc   : > { %p32_p4 = scmp.ge.s32.totalorder %s4907_s26, 2  ;;  %p146_p5 = scmp.ne.s32.totalorder %s3172_s16, %s3168_s15 }
   0xd   : > { %p147_p6 = scmp.eq.s32.totalorder %s2482_s24, 3  ;;  %p2483_p7 = scmp.ge.s32.totalorder %s3196_s22, 1 }
   0xe   : > { %s4909_s26 = smov (%p32_p4, %s4907_s26), 0  ;;  %p154_p9 = scmp.lt.s32.totalorder %s3196_s22, 5 }
   0xf   : > { %p3292_p8 = por %p147_p6, %p146_p5  ;;  %s125_s5 = ssub.s32 %s3192_s21, %s4909_s26 }
  0x10   : > { %s127_s6 = sor.u32 %s126_s28, %s125_s5  ;;  %p3299_p10 = pnand %p2483_p7, %p154_p9 }
  0x11   : > { %p128_p11 = scmp.eq.s32.totalorder %s127_s6, 0  ;;  %p3303_p12 = scmp.eq.s32.totalorder %s2481_s23, 0 }
  0x12   : > { %p2960_p13 = pneg %p3299_p10  ;;  %s3198_s10 = smov [#allocation2]  }
  0x13   : > { %s3310_s9 = scalar_select %p128_p11, %s3176_s17, %s130_s27  }
  0x14   : > { %s172_s11 = sshll.u32 %s3198_s10, 4  ;;  %p3314_p0 = pnand %p3303_p12, %p2960_p13  ;;  %s173_s11 = int_to_ptr.vmem [resolvable:$true] %s172_s11 }
  0x15   : > { %s3085_s13 = scalar_lea.vmem %s173_s11, 8192  ;;  %p3093_p6 = scmp.lt.s32.totalorder %s173_s11, %s173_s11 }
  0x16   : > { %p3076_p1 = pneg %p3314_p0  ;;  %p3086_p2 = scmp.ne.s32.totalorder %s173_s11, %s3085_s13 }
  0x17   : > { %p3094_p7 = scmp.lt.s32.totalorder %s3085_s13, %s3085_s13 }
  0x18   : > { %p3088_p4 = pnand %p3086_p2, %p3076_p1 }
  0x19   : > { %p3095_p9 = por %p3094_p7, %p3093_p6 }
  0x1a   : > { %p3089_p5 = pneg %p3088_p4 }
  0x1c   : > { %p3096_p11 = pnand %p3095_p9, %p3089_p5 }
  0x1e   : > { %3099 = shalt.err (!%p3096_p11)
}
  0x1f   : > { %s3199_s14 = smov 128   ;;  %s3200_s23 = smov 8  }
  0x20   : > { %2963 = dma.hbm_to_vmem [thread:$0]  (!%p3314_p0), %s4890_s3, 8192, %s173_s11, [#allocation3], %s3199_s14, %s3199_s14, %s3200_s23  }
  0x21   : > { %201 = sbr.rel (%p3299_p10) target bundleno = 796 (0x31c), region = 36 }
  0x26   : > { %3159 = dma.done.wait (%p3303_p12), [#allocation3], 8192  }
  0x27   : > { %3161 = vsyncadd (%p3303_p12), [#allocation3], 4294959104  ;;  %s3332_s28 = sshll.u32 %s3180_s18, 4  ;;  %p232_p13 = scmp.lt.s32.totalorder %s3184_s19, 1  ;;  %v3201_v0 = vmov 0   ;;  %vm395_vm0 = vcmask 523264   ;;  %v712_v25 = vlaneseq }
  0x28   : > { %452 = vmatprep.mubr.bf16.mxu0 %v3201_v0  ;;  %565 = vmatprep.mubr.bf16.mxu1 %v3201_v0  ;;  %p234_p10 = scmp.lt.s32.totalorder %s3332_s28, 31  ;;  %v3042_v1 = vld [vmem:[%s4888_s1 + $0x64] ss:$16 sps:$4 sm:$0xff]   ;;  %v3044_v2 = vld [vmem:[%s4888_s1 + $0x6c] ss:$16 sps:$4 sm:$0xff]   ;;  %s228_s12 = sand.u32 1, %s3172_s16  }
  0x29   : > { %s233_s5 = scalar_select %p232_p13, %s3184_s19, 1  ;;  %428 = vmatprep.subr.bf16.mxu0 %v3042_v1  ;;  %v3046_v3 = vld [vmem:[%s4888_s1 + $0x60] ss:$16 sps:$4 sm:$0xff]   ;;  %v3047_v4 = vld [vmem:[%s4888_s1 + $0x68] ss:$16 sps:$4 sm:$0xff]   ;;  %541 = vmatprep.subr.bf16.mxu1 %v3044_v2  ;;  %v713_v26 = vshrl.u32 %v712_v25, 7 }
  0x2a   : > { %s235_s6 = scalar_select %p234_p10, %s3332_s28, 31  ;;  %v3048_v5 = vld [vmem:[%s4888_s1 + $0x44] ss:$16 sps:$4 sm:$0xff]   ;;  %429 = vmatpush1.bf16.msra.mxu0 %v3046_v3  ;;  %542 = vmatpush1.bf16.msra.mxu1 %v3047_v4  ;;  %v3050_v6 = vld [vmem:[%s4888_s1 + $0x4c] ss:$16 sps:$4 sm:$0xff]  }
  0x2b   : > { %s2490_s8 = sshll.u32 %s233_s5, 5  ;;  %v3052_v7 = vld [vmem:[%s4888_s1 + $0x40] ss:$16 sps:$4 sm:$0xff]   ;;  %430 = vmatprep.subr.bf16.mxu0 %v3048_v5  ;;  %v3053_v8 = vld [vmem:[%s4888_s1 + $0x48] ss:$16 sps:$4 sm:$0xff]   ;;  %543 = vmatprep.subr.bf16.mxu1 %v3050_v6  ;;  %v722_v27 = vsub.s32 2, %v713_v26 }
  0x2c   : > { %s237_s7 = sadd.s32 %s2490_s8, %s235_s6  ;;  %v3054_v9 = vld [vmem:[%s4888_s1 + $0x24] ss:$16 sps:$4 sm:$0xff]   ;;  %v3056_v10 = vld [vmem:[%s4888_s1 + $0x2c] ss:$16 sps:$4 sm:$0xff]   ;;  %v3058_v11 = vld [vmem:[%s4888_s1 + $0x20] ss:$16 sps:$4 sm:$0xff]  }
  0x2d   : > { %s2491_s6 = sshll.u32 %s237_s7, 2  ;;  %v3059_v12 = vld [vmem:[%s4888_s1 + $0x28] ss:$16 sps:$4 sm:$0xff]   ;;  %v3060_v13 = vld [vmem:[%s4888_s1 + $0x4] ss:$16 sps:$4 sm:$0xff]   ;;  %v714_v28 = vsub.s32 0, %v713_v26 }
  0x2e   : > { %431 = vmatpush1.bf16.msra.mxu0 %v3052_v7  ;;  %544 = vmatpush1.bf16.msra.mxu1 %v3053_v8  ;;  %v3062_v14 = vld [vmem:[%s4888_s1 + $0xc] ss:$16 sps:$4 sm:$0xff]   ;;  %s3385_s8 = scalar_lea.vmem %s4887_s0, %s2491_s6  ;;  %v3064_v15 = vld [vmem:[%s4888_s1] ss:$16 sps:$4 sm:$0xff]   ;;  %v3065_v16 = vld [vmem:[%s4888_s1 + $0x8] ss:$16 sps:$4 sm:$0xff]  }
  0x2f   : > { %432 = vmatprep.subr.bf16.mxu0 %v3054_v9  ;;  %545 = vmatprep.subr.bf16.mxu1 %v3056_v10  ;;  %v3066_v17 = vld [vmem:[%s3385_s8] sm:$0xff]   ;;  %v3067_v18 = vld [vmem:[%s3385_s8 + $0x8] sm:$0xff]   ;;  %v3068_v19 = vld [vmem:[%s3385_s8 + $0x10] sm:$0xff]   ;;  %v718_v38 = vsub.s32 1, %v713_v26  ;;  %v726_v49 = vsub.s32 3, %v713_v26  ;;  %s2488_s18 = sshll.u32 %s228_s12, 7 }
  0x30   : > { %v3069_v20 = vld [vmem:[%s3385_s8 + $0x18] sm:$0xff]   ;;  %v3070_v21 = vld [vmem:[%s3385_s8 + $0x20] sm:$0xff]   ;;  %v3071_v22 = vld [vmem:[%s3385_s8 + $0x28] sm:$0xff]   ;;  %s4806_s7 = scalar_lea.vmem [#allocation5], %s2488_s18  ;;  %s2790_s13 = sshll.u32 %s3184_s19, 5 }
  0x31   : > { %v3072_v23 = vld [vmem:[%s3385_s8 + $0x30] sm:$0xff]   ;;  %v3073_v24 = vld [vmem:[%s3385_s8 + $0x38] sm:$0xff]   ;;  %v646_v29 = vld [vmem:[%s4889_s2] sm:$0xf]  ;;  %s2384_s14 = sadd.s32 %s2790_s13, %s3332_s28  ;;  %s2387_s8 = sshll.u32 %s4806_s7, 4  ;;  %s4831_s8 = int_to_ptr.vmem [resolvable:$true] %s2387_s8 }
  0x32   : > { %433 = vmatpush1.bf16.msra.mxu0 %v3058_v11  ;;  %546 = vmatpush1.bf16.msra.mxu1 %v3059_v12  ;;  %v2032_v30 = vld [vmem:[#allocation2 + $0xf8] sm:$0xff]  ;;  %v2031_v34 = vld [vmem:[#allocation2 + $0xf0] sm:$0xff]  ;;  %v3435_v36 = vrot.slane %v646_v29, %v722_v27  ;;  %v3437_v37 = vrot.slane %v646_v29, %v714_v28  ;;  %v2030_v45 = vld [vmem:[#allocation2 + $0xe8] sm:$0xff]  ;;  %v3441_v56 = vrot.slane %v646_v29, %v718_v38  ;;  %s2791_s23 = sshll.u32 %s2384_s14, 7  ;;  %s4836_s28 = scalar_lea.sflag [#allocation4], %s228_s12 }
  0x33   : > { %434 = vmatprep.subr.bf16.mxu0 %v3060_v13  ;;  %547 = vmatprep.subr.bf16.mxu1 %v3062_v14  ;;  %v2064_v31 = vld [vmem:[#allocation2 + $0x1f8] sm:$0xff]  ;;  %v2063_v35 = vld [vmem:[#allocation2 + $0x1f0] sm:$0xff]  ;;  %v2062_v46 = vld [vmem:[#allocation2 + $0x1e8] sm:$0xff]  ;;  %v3443_v3 = vrot.slane %v646_v29, %v726_v49  ;;  %s4829_s19 = scalar_lea.hbm %s4891_s4, %s2791_s23  ;;  %s3100_s5 = scalar_lea.vmem %s4831_s8, 2048 }
  0x34   : > { %v2016_v32 = vld [vmem:[#allocation2 + $0x78] sm:$0xff]  ;;  %v2015_v39 = vld [vmem:[#allocation2 + $0x70] sm:$0xff]  ;;  %v2014_v47 = vld [vmem:[#allocation2 + $0x68] sm:$0xff]  ;;  %p3101_p12 = scmp.ne.s32.totalorder %s4831_s8, %s3100_s5  ;;  %s3203_s10 = smov [#allocation5]  }
  0x35   : > { %v2048_v33 = vld [vmem:[#allocation2 + $0x178] sm:$0xff]  ;;  %v2047_v40 = vld [vmem:[#allocation2 + $0x170] sm:$0xff]  ;;  %v2046_v50 = vld [vmem:[#allocation2 + $0x168] sm:$0xff]  ;;  %s3104_s6 = sshll.u32 %s3203_s10, 4  ;;  %s3105_s6 = int_to_ptr.vmem [resolvable:$false] %s3104_s6 }
  0x36   : > { %435 = vmatpush1.bf16.msra.mxu0 %v3064_v15  ;;  %548 = vmatpush1.bf16.msra.mxu1 %v3065_v16  ;;  %v2029_v51 = vld [vmem:[#allocation2 + $0xe0] sm:$0xff]  ;;  %v2028_v61 = vld [vmem:[#allocation2 + $0xd8] sm:$0xff]  ;;  %v2027_v8 = vld [vmem:[#allocation2 + $0xd0] sm:$0xff]  ;;  %p3102_p0 = pnand %p3101_p12, %p3283_p3  ;;  %s3106_s11 = scalar_lea.vmem %s3105_s6, 4096 }
  0x37   : > { %2794 = vmatprep.subr.mxu0 %v2032_v30  ;;  %2874 = vmatprep.subr.mxu1 %v2064_v31  ;;  %v2061_v52 = vld [vmem:[#allocation2 + $0x1e0] sm:$0xff]  ;;  %v2060_v62 = vld [vmem:[#allocation2 + $0x1d8] sm:$0xff]  ;;  %v2059_v9 = vld [vmem:[#allocation2 + $0x1d0] sm:$0xff]  ;;  %p3107_p2 = scmp.lt.s32.totalorder %s4831_s8, %s3105_s6  ;;  %p3108_p4 = scmp.lt.s32.totalorder %s3106_s11, %s3100_s5 }
  0x38   : > { %v2013_v57 = vld [vmem:[#allocation2 + $0x60] sm:$0xff]  ;;  %v2044_v1 = vld [vmem:[#allocation2 + $0x158] sm:$0xff]  ;;  %v2011_v12 = vld [vmem:[#allocation2 + $0x50] sm:$0xff]  ;;  %p3103_p1 = pneg %p3102_p0 }
  0x39   : > { %2516 = vmatmul.mubr.msk.bf16.vlgmr.msra.gmra.mxu0 %vm395_vm0, %v3066_v17  ;;  %2524 = vmatmul.mubr.msk.bf16.vlgmr.msra.gmra.mxu1 %vm395_vm0, %v3066_v17  ;;  %v2045_v58 = vld [vmem:[#allocation2 + $0x160] sm:$0xff]  ;;  %v2043_v13 = vld [vmem:[#allocation2 + $0x150] sm:$0xff]  ;;  %v2026_v15 = vld [vmem:[#allocation2 + $0xc8] sm:$0xff]  ;;  %p3109_p5 = por %p3108_p4, %p3107_p2 }
  0x3a   : > { %462 = vmatprep.mubr.bf16.mxu0 %v3201_v0  ;;  %575 = vmatprep.mubr.bf16.mxu1 %v3201_v0  ;;  %v2058_v16 = vld [vmem:[#allocation2 + $0x1c8] sm:$0xff]  ;;  %v2057_v26 = vld [vmem:[#allocation2 + $0x1c0] sm:$0xff] }
  0x3b   : > { %2795 = vmatpush3.msra.mxu0 %v2016_v32  ;;  %2875 = vmatpush3.msra.mxu1 %v2048_v33  ;;  %v2009_v28 = vld [vmem:[#allocation2 + $0x40] sm:$0xff]  ;;  %v2056_v33 = vld [vmem:[#allocation2 + $0x1b8] sm:$0xff]  ;;  %p3110_p6 = pnand %p3109_p5, %p3103_p1 }
  0x3c   : > { %2796 = vmatprep.subr.mxu0 %v2031_v34  ;;  %2876 = vmatprep.subr.mxu1 %v2063_v35  ;;  %v2041_v29 = vld [vmem:[#allocation2 + $0x140] sm:$0xff]  ;;  %v2024_v34 = vld [vmem:[#allocation2 + $0xb8] sm:$0xff] }
  0x3d   : > { %2797 = vmatpush3.msra.mxu0 %v2015_v39  ;;  %2877 = vmatpush3.msra.mxu1 %v2047_v40  ;;  %v2008_v39 = vld [vmem:[#allocation2 + $0x38] sm:$0xff] }
  0x3e   : > { %2798 = vmatprep.subr.mxu0 %v2030_v45  ;;  %2878 = vmatprep.subr.mxu1 %v2062_v46  ;;  %v2040_v40 = vld [vmem:[#allocation2 + $0x138] sm:$0xff] }
  0x3f   : > { %2799 = vmatpush3.msra.mxu0 %v2014_v47  ;;  %2879 = vmatpush3.msra.mxu1 %v2046_v50  ;;  %v2007_v47 = vld [vmem:[#allocation2 + $0x30] sm:$0xff] }
  0x40   : > { %2800 = vmatprep.subr.mxu0 %v2029_v51  ;;  %2880 = vmatprep.subr.mxu1 %v2061_v52  ;;  %v2022_v51 = vld [vmem:[#allocation2 + $0xa8] sm:$0xff] }
  0x41   : > { %2517 = vmatmul.mubr.msk.bf16.gmra.mxu0 %vm395_vm0, %v3067_v18  ;;  %2525 = vmatmul.mubr.msk.bf16.gmra.mxu1 %vm395_vm0, %v3067_v18  ;;  %v2054_v52 = vld [vmem:[#allocation2 + $0x1a8] sm:$0xff] }
  0x42   : > { %472 = vmatprep.mubr.bf16.mxu0 %v3201_v0  ;;  %585 = vmatprep.mubr.bf16.mxu1 %v3201_v0 }
  0x43   : > { %2801 = vmatpush3.msra.mxu0 %v2013_v57  ;;  %2881 = vmatpush3.msra.mxu1 %v2045_v58 }
  0x44   : > { %2802 = vmatprep.subr.mxu0 %v2028_v61  ;;  %2882 = vmatprep.subr.mxu1 %v2060_v62  ;;  %v2053_v61 = vld [vmem:[#allocation2 + $0x1a0] sm:$0xff] }
  0x45   : > { %2883 = vmatpush3.msra.mxu1 %v2044_v1  ;;  %v2037_v1 = vld [vmem:[#allocation2 + $0x120] sm:$0xff] }
  0x46   : > { %2884 = vmatprep.subr.mxu1 %v2059_v9  ;;  %v2004_v9 = vld [vmem:[#allocation2 + $0x18] sm:$0xff] }
  0x47   : > { %2885 = vmatpush3.msra.mxu1 %v2043_v13  ;;  %v2019_v13 = vld [vmem:[#allocation2 + $0x90] sm:$0xff] }
  0x48   : > { %2886 = vmatprep.subr.mxu1 %v2058_v16  ;;  %v2003_v16 = vld [vmem:[#allocation2 + $0x10] sm:$0xff] }
  0x49   : > { %2518 = vmatmul.mubr.msk.bf16.gmra.mxu0 %vm395_vm0, %v3068_v19  ;;  %2526 = vmatmul.mubr.msk.bf16.gmra.mxu1 %vm395_vm0, %v3068_v19 }
  0x4a   : > { %482 = vmatprep.mubr.bf16.mxu0 %v3201_v0  ;;  %595 = vmatprep.mubr.bf16.mxu1 %v3201_v0 }
  0x51   : > { %2519 = vmatmul.mubr.msk.bf16.gmra.mxu0 %vm395_vm0, %v3069_v20  ;;  %2527 = vmatmul.mubr.msk.bf16.gmra.mxu1 %vm395_vm0, %v3069_v20  ;;  %v2010_v20 = vld [vmem:[#allocation2 + $0x48] sm:$0xff] }
  0x52   : > { %492 = vmatprep.mubr.bf16.mxu0 %v3201_v0  ;;  %605 = vmatprep.mubr.bf16.mxu1 %v3201_v0 }
  0x59   : > { %2520 = vmatmul.mubr.msk.bf16.gmra.mxu0 %vm395_vm0, %v3070_v21  ;;  %2528 = vmatmul.mubr.msk.bf16.gmra.mxu1 %vm395_vm0, %v3070_v21  ;;  %v2042_v21 = vld [vmem:[#allocation2 + $0x148] sm:$0xff] }
  0x5a   : > { %502 = vmatprep.mubr.bf16.mxu0 %v3201_v0  ;;  %615 = vmatprep.mubr.bf16.mxu1 %v3201_v0 }
  0x5b   : > { %2887 = vmatpush3.msra.mxu1 %v2042_v21  ;;  %v2018_v21 = vld [vmem:[#allocation2 + $0x88] sm:$0xff] }
  0x5c   : > { %2888 = vmatprep.subr.mxu1 %v2057_v26  ;;  %v2002_v26 = vld [vmem:[#allocation2 + $0x8] sm:$0xff] }
  0x5d   : > { %2889 = vmatpush3.msra.mxu1 %v2041_v29  ;;  %v2017_v29 = vld [vmem:[#allocation2 + $0x80] sm:$0xff] }
  0x5e   : > { %2890 = vmatprep.subr.mxu1 %v2056_v33 }
  0x5f   : > { %2891 = vmatpush3.msra.mxu1 %v2040_v40 }
  0x61   : > { %2521 = vmatmul.mubr.msk.bf16.gmra.mxu0 %vm395_vm0, %v3071_v22  ;;  %2529 = vmatmul.mubr.msk.bf16.gmra.mxu1 %vm395_vm0, %v3071_v22 }
  0x62   : > { %512 = vmatprep.mubr.bf16.mxu0 %v3201_v0  ;;  %625 = vmatprep.mubr.bf16.mxu1 %v3201_v0 }
  0x69   : > { %2522 = vmatmul.mubr.msk.bf16.gmra.mxu0 %vm395_vm0, %v3072_v23  ;;  %2530 = vmatmul.mubr.msk.bf16.gmra.mxu1 %vm395_vm0, %v3072_v23 }
  0x6a   : > { %522 = vmatprep.mubr.bf16.mxu0 %v3201_v0  ;;  %635 = vmatprep.mubr.bf16.mxu1 %v3201_v0  ;;  %v2012_v0 = vld [vmem:[#allocation2 + $0x58] sm:$0xff] }
  0x6b   : > { %2803 = vmatpush3.msra.mxu0 %v2012_v0  ;;  %v2005_v0 = vld [vmem:[#allocation2 + $0x20] sm:$0xff] }
  0x6c   : > { %2804 = vmatprep.subr.mxu0 %v2027_v8 }
  0x6d   : > { %2805 = vmatpush3.msra.mxu0 %v2011_v12 }
  0x6e   : > { %2806 = vmatprep.subr.mxu0 %v2026_v15 }
  0x6f   : > { %2807 = vmatpush3.msra.mxu0 %v2010_v20 }
  0x71   : > { %2523 = vmatmul.mubr.msk.bf16.gmra.mxu0 %vm395_vm0, %v3073_v24  ;;  %2531 = vmatmul.mubr.msk.bf16.gmra.mxu1 %vm395_vm0, %v3073_v24  ;;  %v2025_v24 = vld [vmem:[#allocation2 + $0xc0] sm:$0xff] }
  0x72   : > { %2808 = vmatprep.subr.mxu0 %v2025_v24 }
  0x73   : > { %2809 = vmatpush3.msra.mxu0 %v2009_v28 }
  0x74   : > { %2810 = vmatprep.subr.mxu0 %v2024_v34  ;;  %v2001_v34 = vld [vmem:[#allocation2] sm:$0xff] }
  0x75   : > { %2811 = vmatpush3.msra.mxu0 %v2008_v39 }
  0xf9   : > { %v454_v41 = vpop.f32.mrf.mxu0  ;;  %v567_v42 = vpop.f32.mrf.mxu1 }
  0xfa   : > { %v647_v43 = vmul.f32 2.0, %v454_v41  ;;  %v649_v44 = vmul.f32 2.0, %v567_v42  ;;  %v2023_v42 = vld [vmem:[#allocation2 + $0xb0] sm:$0xff] }
  0xfb   : > { %v456_v48 = vpop.f32.mrf.mxu0  ;;  %v569_v59 = vpop.f32.mrf.mxu1  ;;  %2812 = vmatprep.subr.mxu0 %v2023_v42 }
  0xfc   : > { %v648_v53 = vmul.f32 2.0, %v456_v48  ;;  %v734_v54 = vsub.f32 %v3435_v36, %v649_v44  ;;  %v732_v55 = vsub.f32 %v3437_v37, %v647_v43  ;;  %v650_v4 = vmul.f32 2.0, %v569_v59  ;;  %v2055_v43 = vld [vmem:[#allocation2 + $0x1b0] sm:$0xff]  ;;  %2813 = vmatpush3.msra.mxu0 %v2007_v47 }
  0xfd   : > { %v458_v60 = vpop.f32.mrf.mxu0  ;;  %v571_v10 = vpop.f32.mrf.mxu1  ;;  %v2039_v48 = vld [vmem:[#allocation2 + $0x130] sm:$0xff]  ;;  %2892 = vmatprep.subr.mxu1 %v2055_v43  ;;  %2814 = vmatprep.subr.mxu0 %v2022_v51 }
  0xfe   : > { %v651_v63 = vmul.f32 2.0, %v458_v60  ;;  %1393 = vmin.index.xlane.f32.xlu1 %v734_v54  ;;  %801 = vmin.index.xlane.f32.xlu0 %v732_v55  ;;  %v733_v6 = vsub.f32 %v3441_v56, %v648_v53  ;;  %v653_v17 = vmul.f32 2.0, %v571_v10  ;;  %v735_v18 = vsub.f32 %v3443_v3, %v650_v4  ;;  %v2006_v54 = vld [vmem:[#allocation2 + $0x28] sm:$0xff]  ;;  %v2021_v60 = vld [vmem:[#allocation2 + $0xa0] sm:$0xff]  ;;  %v2020_v4 = vld [vmem:[#allocation2 + $0x98] sm:$0xff] }
  0xff   : > { %v460_v2 = vpop.f32.mrf.mxu0  ;;  %v573_v22 = vpop.f32.mrf.mxu1  ;;  %v2038_v55 = vld [vmem:[#allocation2 + $0x128] sm:$0xff]  ;;  %2893 = vmatpush3.msra.mxu1 %v2039_v48  ;;  %2815 = vmatpush3.msra.mxu0 %v2006_v54  ;;  %v2036_v10 = vld [vmem:[#allocation2 + $0x118] sm:$0xff] }
 0x100   : > { %v652_v5 = vmul.f32 2.0, %v460_v2  ;;  %v736_v7 = vsub.f32 %v3437_v37, %v651_v63  ;;  %v654_v30 = vmul.f32 2.0, %v573_v22  ;;  %v738_v32 = vsub.f32 %v3435_v36, %v653_v17  ;;  %2894 = vmatprep.subr.mxu1 %v2054_v52  ;;  %2816 = vmatprep.subr.mxu0 %v2021_v60  ;;  %v2035_v17 = vld [vmem:[#allocation2 + $0x110] sm:$0xff]  ;;  %v2050_v22 = vld [vmem:[#allocation2 + $0x188] sm:$0xff] }
 0x101   : > { %v464_v11 = vpop.f32.mrf.mxu0  ;;  %v577_v38 = vpop.f32.mrf.mxu1  ;;  %2895 = vmatpush3.msra.mxu1 %v2038_v55  ;;  %2817 = vmatpush3.msra.mxu0 %v2005_v0 }
 0x102   : > { %v655_v14 = vmul.f32 2.0, %v464_v11  ;;  %1089 = vmin.index.xlane.f32.xlu0 %v733_v6  ;;  %803 = vmin.index.xlane.f32.xlu1 %v736_v7  ;;  %v737_v19 = vsub.f32 %v3441_v56, %v652_v5  ;;  %v657_v41 = vmul.f32 2.0, %v577_v38  ;;  %v739_v45 = vsub.f32 %v3443_v3, %v654_v30  ;;  %v2052_v5 = vld [vmem:[#allocation2 + $0x198] sm:$0xff]  ;;  %v2049_v30 = vld [vmem:[#allocation2 + $0x180] sm:$0xff] }
 0x103   : > { %v466_v23 = vpop.f32.mrf.mxu0  ;;  %v579_v50 = vpop.f32.mrf.mxu1  ;;  %2896 = vmatprep.subr.mxu1 %v2053_v61  ;;  %2818 = vmatprep.subr.mxu0 %v2020_v4 }
 0x104   : > { %v740_v27 = vsub.f32 %v3437_v37, %v655_v14  ;;  %v656_v31 = vmul.f32 2.0, %v466_v23  ;;  %v742_v53 = vsub.f32 %v3435_v36, %v657_v41  ;;  %v658_v58 = vmul.f32 2.0, %v579_v50  ;;  %2897 = vmatpush3.msra.mxu1 %v2037_v1  ;;  %v2051_v14 = vld [vmem:[#allocation2 + $0x190] sm:$0xff]  ;;  %2819 = vmatpush3.msra.mxu0 %v2004_v9 }
 0x105   : > { %v468_v35 = vpop.f32.mrf.mxu0  ;;  %v581_v62 = vpop.f32.mrf.mxu1  ;;  %2898 = vmatprep.subr.mxu1 %v2052_v5  ;;  %2820 = vmatprep.subr.mxu0 %v2019_v13 }
 0x106   : > { %1697 = vmin.index.xlane.f32.xlu0 %v735_v18  ;;  %1091 = vmin.index.xlane.f32.xlu1 %v737_v19  ;;  %v659_v44 = vmul.f32 2.0, %v468_v35  ;;  %v741_v46 = vsub.f32 %v3441_v56, %v656_v31  ;;  %v661_v6 = vmul.f32 2.0, %v581_v62  ;;  %v743_v7 = vsub.f32 %v3443_v3, %v658_v58  ;;  %v2033_v35 = vld [vmem:[#allocation2 + $0x100] sm:$0xff] }
 0x107   : > { %v470_v49 = vpop.f32.mrf.mxu0  ;;  %v583_v11 = vpop.f32.mrf.mxu1  ;;  %2899 = vmatpush3.msra.mxu1 %v2036_v10  ;;  %2821 = vmatpush3.msra.mxu0 %v2003_v16 }
 0x108   : > { %v660_v57 = vmul.f32 2.0, %v470_v49  ;;  %v744_v59 = vsub.f32 %v3437_v37, %v659_v44  ;;  %v662_v18 = vmul.f32 2.0, %v583_v11  ;;  %v746_v20 = vsub.f32 %v3435_v36, %v661_v6  ;;  %2900 = vmatprep.subr.mxu1 %v2051_v14  ;;  %2822 = vmatprep.subr.mxu0 %v2018_v21 }
 0x109   : > { %v474_v63 = vpop.f32.mrf.mxu0  ;;  %v587_v24 = vpop.f32.mrf.mxu1  ;;  %2901 = vmatpush3.msra.mxu1 %v2035_v17  ;;  %2823 = vmatpush3.msra.mxu0 %v2002_v26 }
 0x10a   : > { %1395 = vmin.index.xlane.f32.xlu0 %v738_v32  ;;  %805 = vmin.index.xlane.f32.xlu1 %v740_v27  ;;  %v663_v2 = vmul.f32 2.0, %v474_v63  ;;  %v745_v8 = vsub.f32 %v3441_v56, %v660_v57  ;;  %v2034_v27 = vld [vmem:[#allocation2 + $0x108] sm:$0xff]  ;;  %v665_v28 = vmul.f32 2.0, %v587_v24  ;;  %v747_v32 = vsub.f32 %v3443_v3, %v662_v18 }
 0x10b   : > { %v476_v12 = vpop.f32.mrf.mxu0  ;;  %2902 = vmatprep.subr.mxu1 %v2050_v22  ;;  %v589_v39 = vpop.f32.mrf.mxu1  ;;  %2824 = vmatprep.subr.mxu0 %v2017_v29 }
 0x10c   : > { %v748_v15 = vsub.f32 %v3437_v37, %v663_v2  ;;  %v664_v19 = vmul.f32 2.0, %v476_v12  ;;  %2903 = vmatpush3.msra.mxu1 %v2034_v27  ;;  %v750_v40 = vsub.f32 %v3435_v36, %v665_v28  ;;  %2825 = vmatpush3.msra.mxu0 %v2001_v34  ;;  %v666_v42 = vmul.f32 2.0, %v589_v39 }
 0x10d   : > { %v478_v23 = vpop.f32.mrf.mxu0  ;;  %2904 = vmatprep.subr.mxu1 %v2049_v30  ;;  %v591_v44 = vpop.f32.mrf.mxu1 }
 0x10e   : > { %1699 = vmin.index.xlane.f32.xlu0 %v739_v45  ;;  %1093 = vmin.index.xlane.f32.xlu1 %v741_v46  ;;  %v667_v31 = vmul.f32 2.0, %v478_v23  ;;  %v749_v33 = vsub.f32 %v3441_v56, %v664_v19  ;;  %v669_v47 = vmul.f32 2.0, %v591_v44  ;;  %v751_v48 = vsub.f32 %v3443_v3, %v666_v42 }
 0x10f   : > { %v480_v38 = vpop.f32.mrf.mxu0  ;;  %2905 = vmatpush3.msra.mxu1 %v2033_v35  ;;  %v593_v50 = vpop.f32.mrf.mxu1 }
 0x110   : > { %v668_v41 = vmul.f32 2.0, %v480_v38  ;;  %v752_v43 = vsub.f32 %v3437_v37, %v667_v31  ;;  %v754_v55 = vsub.f32 %v3435_v36, %v669_v47 }
 0x111   : > { %v484_v45 = vpop.f32.mrf.mxu0  ;;  %v597_v58 = vpop.f32.mrf.mxu1 }
 0x112   : > { %1397 = vmin.index.xlane.f32.xlu0 %v742_v53  ;;  %807 = vmin.index.xlane.f32.xlu1 %v744_v59  ;;  %v671_v46 = vmul.f32 2.0, %v484_v45  ;;  %v753_v49 = vsub.f32 %v3441_v56, %v668_v41  ;;  %v670_v53 = vmul.f32 2.0, %v593_v50  ;;  %v673_v59 = vmul.f32 2.0, %v597_v58 }
 0x113   : > { %v486_v51 = vpop.f32.mrf.mxu0  ;;  %v599_v0 = vpop.f32.mrf.mxu1 }
 0x114   : > { %v756_v52 = vsub.f32 %v3437_v37, %v671_v46  ;;  %v672_v54 = vmul.f32 2.0, %v486_v51  ;;  %v755_v61 = vsub.f32 %v3443_v3, %v670_v53  ;;  %v758_v1 = vsub.f32 %v3435_v36, %v673_v59 }
 0x115   : > { %v488_v57 = vpop.f32.mrf.mxu0  ;;  %v674_v4 = vmul.f32 2.0, %v599_v0  ;;  %v601_v6 = vpop.f32.mrf.mxu1 }
 0x116   : > { %1701 = vmin.index.xlane.f32.xlu0 %v743_v7  ;;  %1095 = vmin.index.xlane.f32.xlu1 %v745_v8  ;;  %v675_v60 = vmul.f32 2.0, %v488_v57  ;;  %v757_v62 = vsub.f32 %v3441_v56, %v672_v54  ;;  %v677_v9 = vmul.f32 2.0, %v601_v6 }
 0x117   : > { %v490_v63 = vpop.f32.mrf.mxu0  ;;  %v759_v10 = vsub.f32 %v3443_v3, %v674_v4  ;;  %v603_v12 = vpop.f32.mrf.mxu1 }
 0x118   : > { %v676_v2 = vmul.f32 2.0, %v490_v63  ;;  %v760_v5 = vsub.f32 %v3437_v37, %v675_v60  ;;  %v762_v17 = vsub.f32 %v3435_v36, %v677_v9 }
 0x119   : > { %v494_v7 = vpop.f32.mrf.mxu0  ;;  %v607_v19 = vpop.f32.mrf.mxu1 }
 0x11a   : > { %1399 = vmin.index.xlane.f32.xlu0 %v746_v20  ;;  %809 = vmin.index.xlane.f32.xlu1 %v748_v15  ;;  %v679_v8 = vmul.f32 2.0, %v494_v7  ;;  %v761_v11 = vsub.f32 %v3441_v56, %v676_v2  ;;  %v678_v15 = vmul.f32 2.0, %v603_v12  ;;  %v681_v20 = vmul.f32 2.0, %v607_v19 }
 0x11b   : > { %v496_v13 = vpop.f32.mrf.mxu0  ;;  %v609_v26 = vpop.f32.mrf.mxu1 }
 0x11c   : > { %v764_v14 = vsub.f32 %v3437_v37, %v679_v8  ;;  %v680_v16 = vmul.f32 2.0, %v496_v13  ;;  %v763_v22 = vsub.f32 %v3443_v3, %v678_v15  ;;  %v766_v27 = vsub.f32 %v3435_v36, %v681_v20 }
 0x11d   : > { %v498_v18 = vpop.f32.mrf.mxu0  ;;  %v682_v29 = vmul.f32 2.0, %v609_v26  ;;  %v611_v31 = vpop.f32.mrf.mxu1 }
 0x11e   : > { %1703 = vmin.index.xlane.f32.xlu0 %v747_v32  ;;  %1097 = vmin.index.xlane.f32.xlu1 %v749_v33  ;;  %v683_v21 = vmul.f32 2.0, %v498_v18  ;;  %v765_v23 = vsub.f32 %v3441_v56, %v680_v16  ;;  %v685_v34 = vmul.f32 2.0, %v611_v31 }
 0x11f   : > { %v500_v24 = vpop.f32.mrf.mxu0  ;;  %v767_v35 = vsub.f32 %v3443_v3, %v682_v29  ;;  %v613_v39 = vpop.f32.mrf.mxu1 }
 0x120   : > { %v684_v28 = vmul.f32 2.0, %v500_v24  ;;  %v768_v30 = vsub.f32 %v3437_v37, %v683_v21  ;;  %v686_v42 = vmul.f32 2.0, %v613_v39  ;;  %v770_v44 = vsub.f32 %v3435_v36, %v685_v34 }
 0x121   : > { %v504_v32 = vpop.f32.mrf.mxu0  ;;  %v617_v46 = vpop.f32.mrf.mxu1 }
 0x122   : > { %1401 = vmin.index.xlane.f32.xlu0 %v750_v40  ;;  %811 = vmin.index.xlane.f32.xlu1 %v752_v43  ;;  %v687_v33 = vmul.f32 2.0, %v504_v32  ;;  %v769_v38 = vsub.f32 %v3441_v56, %v684_v28  ;;  %v689_v47 = vmul.f32 2.0, %v617_v46 }
 0x123   : > { %v506_v40 = vpop.f32.mrf.mxu0 }
 0x124   : > { %v772_v41 = vsub.f32 %v3437_v37, %v687_v33  ;;  %v688_v43 = vmul.f32 2.0, %v506_v40  ;;  %v774_v53 = vsub.f32 %v3435_v36, %v689_v47 }
 0x125   : > { %v508_v45 = vpop.f32.mrf.mxu0 }
 0x126   : > { %1705 = vmin.index.xlane.f32.xlu0 %v751_v48  ;;  %1099 = vmin.index.xlane.f32.xlu1 %v753_v49  ;;  %v691_v48 = vmul.f32 2.0, %v508_v45  ;;  %v771_v49 = vsub.f32 %v3443_v3, %v686_v42  ;;  %v773_v50 = vsub.f32 %v3441_v56, %v688_v43 }
 0x127   : > { %v510_v51 = vpop.f32.mrf.mxu0 }
 0x128   : > { %v692_v54 = vmul.f32 2.0, %v510_v51  ;;  %v776_v57 = vsub.f32 %v3437_v37, %v691_v48 }
 0x129   : > { %v514_v59 = vpop.f32.mrf.mxu0 }
 0x12a   : > { %1403 = vmin.index.xlane.f32.xlu0 %v754_v55  ;;  %813 = vmin.index.xlane.f32.xlu1 %v756_v52  ;;  %v619_v52 = vpop.f32.mrf.mxu1  ;;  %v695_v60 = vmul.f32 2.0, %v514_v59  ;;  %v777_v63 = vsub.f32 %v3441_v56, %v692_v54  ;;  %v3508_v54 = vand.u32 127, %v712_v25 }
 0x12b   : > { %v690_v55 = vmul.f32 2.0, %v619_v52 }
 0x12c   : > { %v621_v58 = vpop.f32.mrf.mxu1  ;;  %v780_v2 = vsub.f32 %v3437_v37, %v695_v60 }
 0x12e   : > { %1707 = vmin.index.xlane.f32.xlu0 %v755_v61  ;;  %1101 = vmin.index.xlane.f32.xlu1 %v757_v62  ;;  %v693_v61 = vmul.f32 2.0, %v621_v58  ;;  %v775_v62 = vsub.f32 %v3443_v3, %v690_v55  ;;  %v623_v0 = vpop.f32.mrf.mxu1  ;;  %v3514_v55 = vadd.s32 128, %v3508_v54 }
 0x130   : > { %v627_v4 = vpop.f32.mrf.mxu1  ;;  %v778_v7 = vsub.f32 %v3435_v36, %v693_v61 }
 0x131   : > { %v697_v9 = vmul.f32 2.0, %v627_v4 }
 0x132   : > { %1405 = vmin.index.xlane.f32.xlu0 %v758_v1  ;;  %815 = vmin.index.xlane.f32.xlu1 %v760_v5  ;;  %v516_v1 = vpop.f32.mrf.mxu0  ;;  %v694_v5 = vmul.f32 2.0, %v623_v0 }
 0x133   : > { %v696_v6 = vmul.f32 2.0, %v516_v1  ;;  %v782_v15 = vsub.f32 %v3435_v36, %v697_v9 }
 0x134   : > { %v518_v8 = vpop.f32.mrf.mxu0  ;;  %v779_v12 = vsub.f32 %v3443_v3, %v694_v5 }
 0x135   : > { %v781_v13 = vsub.f32 %v3441_v56, %v696_v6 }
 0x136   : > { %1709 = vmin.index.xlane.f32.xlu0 %v759_v10  ;;  %1103 = vmin.index.xlane.f32.xlu1 %v761_v11  ;;  %v629_v10 = vpop.f32.mrf.mxu1  ;;  %v699_v11 = vmul.f32 2.0, %v518_v8 }
 0x137   : > { %v698_v18 = vmul.f32 2.0, %v629_v10 }
 0x138   : > { %v631_v16 = vpop.f32.mrf.mxu1  ;;  %v784_v19 = vsub.f32 %v3437_v37, %v699_v11 }
 0x139   : > { %v783_v24 = vsub.f32 %v3443_v3, %v698_v18 }
 0x13a   : > { %1407 = vmin.index.xlane.f32.xlu0 %v762_v17  ;;  %817 = vmin.index.xlane.f32.xlu1 %v764_v14  ;;  %v520_v14 = vpop.f32.mrf.mxu0 }
 0x13b   : > { %v700_v17 = vmul.f32 2.0, %v520_v14 }
 0x13c   : > { %v524_v20 = vpop.f32.mrf.mxu0 }
 0x13d   : > { %v703_v21 = vmul.f32 2.0, %v524_v20  ;;  %v785_v26 = vsub.f32 %v3441_v56, %v700_v17 }
 0x13e   : > { %1711 = vmin.index.xlane.f32.xlu0 %v763_v22  ;;  %1105 = vmin.index.xlane.f32.xlu1 %v765_v23  ;;  %v633_v22 = vpop.f32.mrf.mxu1  ;;  %v701_v23 = vmul.f32 2.0, %v631_v16 }
 0x13f   : > { %v788_v29 = vsub.f32 %v3437_v37, %v703_v21 }
 0x140   : > { %v637_v28 = vpop.f32.mrf.mxu1  ;;  %v786_v32 = vsub.f32 %v3435_v36, %v701_v23 }
 0x142   : > { %1409 = vmin.index.xlane.f32.xlu0 %v766_v27  ;;  %819 = vmin.index.xlane.f32.xlu1 %v768_v30  ;;  %v526_v27 = vpop.f32.mrf.mxu0  ;;  %v702_v30 = vmul.f32 2.0, %v633_v22  ;;  %v639_v34 = vpop.f32.mrf.mxu1 }
 0x143   : > { %v704_v31 = vmul.f32 2.0, %v526_v27  ;;  %v706_v45 = vmul.f32 2.0, %v639_v34 }
 0x144   : > { %v528_v33 = vpop.f32.mrf.mxu0  ;;  %v787_v39 = vsub.f32 %v3443_v3, %v702_v30  ;;  %v641_v42 = vpop.f32.mrf.mxu1 }
 0x145   : > { %v789_v40 = vsub.f32 %v3441_v56, %v704_v31  ;;  %v709_v48 = vmul.f32 2.0, %v641_v42 }
 0x146   : > { %1713 = vmin.index.xlane.f32.xlu0 %v767_v35  ;;  %1107 = vmin.index.xlane.f32.xlu1 %v769_v38  ;;  %v705_v35 = vmul.f32 2.0, %v637_v28  ;;  %v707_v38 = vmul.f32 2.0, %v528_v33  ;;  %v643_v47 = vpop.f32.mrf.mxu1 }
 0x147   : > { %v794_v52 = vsub.f32 %v3435_v36, %v709_v48 }
 0x148   : > { %v790_v43 = vsub.f32 %v3435_v36, %v705_v35  ;;  %v792_v46 = vsub.f32 %v3437_v37, %v707_v38  ;;  %v3511_v37 = vadd.s32 256, %v3508_v54 }
 0x14a   : > { %1411 = vmin.index.xlane.f32.xlu0 %v770_v44  ;;  %821 = vmin.index.xlane.f32.xlu1 %v772_v41  ;;  %v530_v41 = vpop.f32.mrf.mxu0 }
 0x14b   : > { %v708_v44 = vmul.f32 2.0, %v530_v41 }
 0x14d   : > { %v793_v51 = vsub.f32 %v3441_v56, %v708_v44 }
 0x14e   : > { %1715 = vmin.index.xlane.f32.xlu0 %v771_v49  ;;  %1109 = vmin.index.xlane.f32.xlu1 %v773_v50  ;;  %v710_v49 = vmul.f32 2.0, %v643_v47  ;;  %v791_v50 = vsub.f32 %v3443_v3, %v706_v45 }
 0x152   : > { %1413 = vmin.index.xlane.f32.xlu0 %v774_v53  ;;  %823 = vmin.index.xlane.f32.xlu1 %v776_v57  ;;  %v795_v53 = vsub.f32 %v3443_v3, %v710_v49  ;;  %v3517_v57 = vadd.s32 384, %v3508_v54  ;;  %v3202_v3 = vmov 0.0  }
 0x156   : > { %1717 = vmin.index.xlane.f32.xlu0 %v775_v62  ;;  %1111 = vmin.index.xlane.f32.xlu1 %v777_v63 }
 0x15a   : > { %1415 = vmin.index.xlane.f32.xlu0 %v778_v7  ;;  %825 = vmin.index.xlane.f32.xlu1 %v780_v2 }
 0x15e   : > { %1719 = vmin.index.xlane.f32.xlu0 %v779_v12  ;;  %1113 = vmin.index.xlane.f32.xlu1 %v781_v13 }
 0x162   : > { %1417 = vmin.index.xlane.f32.xlu0 %v782_v15  ;;  %827 = vmin.index.xlane.f32.xlu1 %v784_v19 }
 0x166   : > { %1721 = vmin.index.xlane.f32.xlu0 %v783_v24  ;;  %1115 = vmin.index.xlane.f32.xlu1 %v785_v26 }
 0x16a   : > { %1419 = vmin.index.xlane.f32.xlu0 %v786_v32  ;;  %829 = vmin.index.xlane.f32.xlu1 %v788_v29 }
 0x16e   : > { %1723 = vmin.index.xlane.f32.xlu0 %v787_v39  ;;  %1117 = vmin.index.xlane.f32.xlu1 %v789_v40 }
 0x172   : > { %1421 = vmin.index.xlane.f32.xlu0 %v790_v43  ;;  %831 = vmin.index.xlane.f32.xlu1 %v792_v46 }
 0x176   : > { %1725 = vmin.index.xlane.f32.xlu0 %v791_v50  ;;  %1119 = vmin.index.xlane.f32.xlu1 %v793_v51 }
 0x17a   : > { %1423 = vmin.index.xlane.f32.xlu0 %v794_v52  ;;  %1727 = vmin.index.xlane.f32.xlu1 %v795_v53 }
 0x187   : > { %v1394_v56 = vpop.xlane.xlu1 %1393  ;;  %v802_v58 = vpop.xlane.xlu0 %801 }
 0x188   : > { %v1425_v59 = vadd.s32 256, %v1394_v56  ;;  %vm833_vm1 = vcmp.eq.s32.totalorder %v3508_v54, %v802_v58  ;;  %vm834_vm2 = vcmp.eq.s32.totalorder %v3514_v55, %v802_v58  ;;  %vm835_vm3 = vcmp.eq.s32.totalorder %v3511_v37, %v802_v58 }
 0x189   : > { %vm836_vm4 = vcmp.eq.s32.totalorder %v3517_v57, %v802_v58  ;;  %v2532_v60 = vsel %vm833_vm1, 1.0, %v3202_v3  ;;  %v2533_v62 = vsel %vm834_vm2, 1.0, %v3202_v3  ;;  %v2534_v63 = vsel %vm835_vm3, 1.0, %v3202_v3 }
 0x18a   : > { %vm1441_vm5 = vcmp.eq.s32.totalorder %v3508_v54, %v1425_v59  ;;  %vm1443_vm6 = vcmp.eq.s32.totalorder %v3511_v37, %v1425_v59  ;;  %v2535_v0 = vsel %vm836_vm4, 1.0, %v3202_v3  ;;  %vm1442_vm10 = vcmp.eq.s32.totalorder %v3514_v55, %v1425_v59 }
 0x18b   : > { %v1090_v25 = vpop.xlane.xlu0 %1089  ;;  %v804_v36 = vpop.xlane.xlu1 %803  ;;  %v2660_v1 = vsel %vm1441_vm5, 1.0, %v3202_v3  ;;  %vm1444_vm11 = vcmp.eq.s32.totalorder %v3517_v57, %v1425_v59  ;;  %v2662_v13 = vsel %vm1443_vm6, 1.0, %v3202_v3  ;;  %v2661_v20 = vsel %vm1442_vm10, 1.0, %v3202_v3 }
 0x18c   : > { %v1121_v61 = vadd.s32 128, %v1090_v25  ;;  %vm837_vm12 = vcmp.eq.s32.totalorder %v3508_v54, %v804_v36  ;;  %vm838_vm14 = vcmp.eq.s32.totalorder %v3514_v55, %v804_v36  ;;  %vm839_vm15 = vcmp.eq.s32.totalorder %v3511_v37, %v804_v36 }
 0x18d   : > { %vm840_vm0 = vcmp.eq.s32.totalorder %v3517_v57, %v804_v36  ;;  %v3554_v18 = vsel %vm837_vm12, 1.0, %v3202_v3  ;;  %v2537_v19 = vsel %vm838_vm14, 1.0, %v3202_v3  ;;  %v3564_v22 = vsel %vm839_vm15, 1.0, %v3202_v3 }
 0x18e   : > { %vm1137_vm7 = vcmp.eq.s32.totalorder %v3508_v54, %v1121_v61  ;;  %vm1138_vm8 = vcmp.eq.s32.totalorder %v3514_v55, %v1121_v61  ;;  %vm1139_vm9 = vcmp.eq.s32.totalorder %v3511_v37, %v1121_v61  ;;  %vm1140_vm13 = vcmp.eq.s32.totalorder %v3517_v57, %v1121_v61 }
 0x18f   : > { %v2596_v2 = vsel %vm1137_vm7, 1.0, %v3202_v3  ;;  %v2598_v4 = vsel %vm1139_vm9, 1.0, %v3202_v3  ;;  %v1698_v5 = vpop.xlane.xlu0 %1697  ;;  %v1092_v6 = vpop.xlane.xlu1 %1091  ;;  %v2597_v9 = vsel %vm1138_vm8, 1.0, %v3202_v3  ;;  %v2599_v21 = vsel %vm1140_vm13, 1.0, %v3202_v3 }
 0x190   : > { %v1329_v7 = vadd.f32 %v2596_v2, %v2532_v60  ;;  %v1729_v8 = vadd.s32 384, %v1698_v5  ;;  %v1331_v10 = vadd.f32 %v2598_v4, %v2534_v63  ;;  %v3544_v12 = vadd.s32 128, %v1092_v6 }
 0x191   : > { %v1330_v17 = vadd.f32 %v2597_v9, %v2533_v62  ;;  %v2539_v23 = vsel %vm840_vm0, 1.0, %v3202_v3  ;;  %v2663_v26 = vsel %vm1444_vm11, 1.0, %v3202_v3  ;;  %v1332_v31 = vadd.f32 %v2599_v21, %v2535_v0 }
 0x192   : > { %v1633_v11 = vadd.f32 %v2660_v1, %v1329_v7  ;;  %vm1745_vm1 = vcmp.eq.s32.totalorder %v3508_v54, %v1729_v8  ;;  %vm1747_vm2 = vcmp.eq.s32.totalorder %v3511_v37, %v1729_v8  ;;  %v1635_v24 = vadd.f32 %v2662_v13, %v1331_v10 }
 0x193   : > { %v2724_v14 = vsel %vm1745_vm1, 1.0, %v3202_v3  ;;  %v1396_v15 = vpop.xlane.xlu0 %1395  ;;  %v806_v16 = vpop.xlane.xlu1 %805  ;;  %v2726_v27 = vsel %vm1747_vm2, 1.0, %v3202_v3  ;;  %vm1142_vm3 = vcmp.eq.s32.totalorder %v3514_v55, %v3544_v12  ;;  %v1634_v30 = vadd.f32 %v2661_v20, %v1330_v17 }
 0x194   : > { %v1937_v28 = vadd.f32 %v2724_v14, %v1633_v11  ;;  %v3573_v29 = vadd.s32 256, %v1396_v15  ;;  %vm841_vm4 = vcmp.eq.s32.totalorder %v3508_v54, %v806_v16  ;;  %vm1746_vm5 = vcmp.eq.s32.totalorder %v3514_v55, %v1729_v8 }
 0x195   : > { %vm842_vm6 = vcmp.eq.s32.totalorder %v3514_v55, %v806_v16  ;;  %v2725_v34 = vsel %vm1746_vm5, 1.0, %v3202_v3  ;;  %vm1748_vm7 = vcmp.eq.s32.totalorder %v3517_v57, %v1729_v8  ;;  %vm843_vm8 = vcmp.eq.s32.totalorder %v3511_v37, %v806_v16 }
 0x196   : > { %v1938_v38 = vadd.f32 %v2725_v34, %v1634_v30  ;;  %v1636_v39 = vadd.f32 %v2663_v26, %v1332_v31  ;;  %v2727_v40 = vsel %vm1748_vm7, 1.0, %v3202_v3  ;;  %v1939_v41 = vadd.f32 %v2726_v27, %v1635_v24 }
 0x197   : > { %v1700_v32 = vpop.xlane.xlu0 %1699  ;;  %v1094_v33 = vpop.xlane.xlu1 %1093  ;;  %vm1141_vm9 = vcmp.eq.s32.totalorder %v3508_v54, %v3544_v12  ;;  %vm844_vm10 = vcmp.eq.s32.totalorder %v3517_v57, %v806_v16  ;;  %v2601_v42 = vsel %vm1142_vm3, 1.0, %v3202_v3  ;;  %vm1144_vm11 = vcmp.eq.s32.totalorder %v3517_v57, %v3544_v12 }
 0x198   : > { %v3580_v35 = vadd.s32 384, %v1700_v32  ;;  %2129 = vmatprep.mubr.f32.mxu0 %v1938_v38  ;;  %v1940_v43 = vadd.f32 %v2727_v40, %v1636_v39  ;;  %vm1446_vm12 = vcmp.eq.s32.totalorder %v3514_v55, %v3573_v29  ;;  %vm1143_vm14 = vcmp.eq.s32.totalorder %v3511_v37, %v3544_v12 }
 0x199   : > { %v3604_v46 = vsel %vm841_vm4, 1.0, %v3202_v3  ;;  %v3609_v47 = vsel %vm842_vm6, 1.0, %v3202_v3  ;;  %v3614_v48 = vsel %vm843_vm8, 1.0, %v3202_v3  ;;  %2130 = vmatmul.mubr.f32.vlgmr.msra.gmra.mxu0 %v1937_v28  ;;  %v3617_v49 = vsel %vm844_vm10, 1.0, %v3202_v3 }
 0x19a   : > { %vm1750_vm13 = vcmp.eq.s32.totalorder %v3514_v55, %v3580_v35  ;;  %2274 = vmatprep.mubr.f32.mxu1 %v1940_v43  ;;  %v3619_v50 = vadd.s32 128, %v1094_v33  ;;  %v1334_v52 = vadd.f32 %v2601_v42, %v2537_v19  ;;  %v2665_v53 = vsel %vm1446_vm12, 1.0, %v3202_v3 }
 0x19b   : > { %v1398_v44 = vpop.xlane.xlu0 %1397  ;;  %v3593_v45 = vpop.xlane.xlu1 %807  ;;  %2275 = vmatmul.mubr.f32.vlgmr.msra.gmra.mxu1 %v1939_v41  ;;  %v2729_v56 = vsel %vm1750_vm13, 1.0, %v3202_v3  ;;  %v2603_v58 = vsel %vm1144_vm11, 1.0, %v3202_v3  ;;  %vm1448_vm0 = vcmp.eq.s32.totalorder %v3517_v57, %v3573_v29  ;;  %vm1752_vm1 = vcmp.eq.s32.totalorder %v3517_v57, %v3580_v35 }
 0x19c   : > { %v3621_v51 = vadd.s32 256, %v1398_v44  ;;  %vm845_vm15 = vcmp.eq.s32.totalorder %v3508_v54, %v3593_v45  ;;  %v1638_v59 = vadd.f32 %v2665_v53, %v1334_v52  ;;  %v1336_v25 = vadd.f32 %v2603_v58, %v2539_v23 }
 0x19d   : > { %vm846_vm2 = vcmp.eq.s32.totalorder %v3514_v55, %v3593_v45  ;;  %v2667_v61 = vsel %vm1448_vm0, 1.0, %v3202_v3  ;;  %v2731_v62 = vsel %vm1752_vm1, 1.0, %v3202_v3  ;;  %v2600_v63 = vsel %vm1141_vm9, 1.0, %v3202_v3 }
 0x19e   : > { %v1942_v0 = vadd.f32 %v2729_v56, %v1638_v59  ;;  %v1640_v1 = vadd.f32 %v2667_v61, %v1336_v25  ;;  %v1333_v2 = vadd.f32 %v2600_v63, %v3554_v18  ;;  %vm1445_vm3 = vcmp.eq.s32.totalorder %v3508_v54, %v3573_v29 }
 0x19f   : > { %v1702_v36 = vpop.xlane.xlu0 %1701  ;;  %v1096_v60 = vpop.xlane.xlu1 %1095  ;;  %v2664_v4 = vsel %vm1445_vm3, 1.0, %v3202_v3  ;;  %vm1749_vm4 = vcmp.eq.s32.totalorder %v3508_v54, %v3580_v35  ;;  %v2602_v5 = vsel %vm1143_vm14, 1.0, %v3202_v3  ;;  %vm1447_vm5 = vcmp.eq.s32.totalorder %v3511_v37, %v3573_v29 }
 0x1a0   : > { %2134 = vmatprep.mubr.f32.mxu0 %v1942_v0  ;;  %v1944_v6 = vadd.f32 %v2731_v62, %v1640_v1  ;;  %v1637_v7 = vadd.f32 %v2664_v4, %v1333_v2  ;;  %v2728_v8 = vsel %vm1749_vm4, 1.0, %v3202_v3  ;;  %v1335_v9 = vadd.f32 %v2602_v5, %v3564_v22 }
 0x1a1   : > { %vm847_vm6 = vcmp.eq.s32.totalorder %v3511_v37, %v3593_v45  ;;  %vm848_vm7 = vcmp.eq.s32.totalorder %v3517_v57, %v3593_v45  ;;  %v2666_v12 = vsel %vm1447_vm5, 1.0, %v3202_v3  ;;  %vm1751_vm8 = vcmp.eq.s32.totalorder %v3511_v37, %v3580_v35 }
 0x1a2   : > { %2279 = vmatprep.mubr.f32.mxu1 %v1944_v6  ;;  %v1731_v13 = vadd.s32 384, %v1702_v36  ;;  %v1941_v14 = vadd.f32 %v2728_v8, %v1637_v7  ;;  %v1639_v15 = vadd.f32 %v2666_v12, %v1335_v9  ;;  %v2730_v16 = vsel %vm1751_vm8, 1.0, %v3202_v3 }
 0x1a3   : > { %v1400_v10 = vpop.xlane.xlu0 %1399  ;;  %v3657_v11 = vpop.xlane.xlu1 %809  ;;  %vm1145_vm9 = vcmp.eq.s32.totalorder %v3508_v54, %v3619_v50  ;;  %vm1146_vm10 = vcmp.eq.s32.totalorder %v3514_v55, %v3619_v50  ;;  %vm1147_vm11 = vcmp.eq.s32.totalorder %v3511_v37, %v3619_v50  ;;  %vm1148_vm12 = vcmp.eq.s32.totalorder %v3517_v57, %v3619_v50 }
 0x1a4   : > { %v3679_v17 = vsel %vm845_vm15, 1.0, %v3202_v3  ;;  %v3685_v18 = vsel %vm846_vm2, 1.0, %v3202_v3  ;;  %v3688_v19 = vsel %vm847_vm6, 1.0, %v3202_v3  ;;  %2135 = vmatmul.mubr.f32.gmra.mxu0 %v1941_v14  ;;  %v1943_v20 = vadd.f32 %v2730_v16, %v1639_v15 }
 0x1a5   : > { %v3694_v23 = vsel %vm848_vm7, 1.0, %v3202_v3  ;;  %v3696_v24 = vadd.s32 128, %v1096_v60  ;;  %v3698_v26 = vadd.s32 256, %v1400_v10  ;;  %vm849_vm13 = vcmp.eq.s32.totalorder %v3508_v54, %v3657_v11 }
 0x1a6   : > { %2280 = vmatmul.mubr.f32.gmra.mxu1 %v1943_v20  ;;  %v2605_v27 = vsel %vm1146_vm10, 1.0, %v3202_v3  ;;  %vm1450_vm14 = vcmp.eq.s32.totalorder %v3514_v55, %v3621_v51  ;;  %vm1754_vm15 = vcmp.eq.s32.totalorder %v3514_v55, %v1731_v13  ;;  %v2607_v28 = vsel %vm1148_vm12, 1.0, %v3202_v3 }
 0x1a7   : > { %v1704_v21 = vpop.xlane.xlu0 %1703  ;;  %v1098_v22 = vpop.xlane.xlu1 %1097  ;;  %vm850_vm0 = vcmp.eq.s32.totalorder %v3514_v55, %v3657_v11  ;;  %v1338_v29 = vadd.f32 %v2605_v27, %v3609_v47  ;;  %v2669_v30 = vsel %vm1450_vm14, 1.0, %v3202_v3  ;;  %v2733_v31 = vsel %vm1754_vm15, 1.0, %v3202_v3 }
 0x1a8   : > { %v1340_v32 = vadd.f32 %v2607_v28, %v3617_v49  ;;  %vm1452_vm1 = vcmp.eq.s32.totalorder %v3517_v57, %v3621_v51  ;;  %vm1756_vm2 = vcmp.eq.s32.totalorder %v3517_v57, %v1731_v13  ;;  %v2604_v33 = vsel %vm1145_vm9, 1.0, %v3202_v3 }
 0x1a9   : > { %v1642_v35 = vadd.f32 %v2669_v30, %v1338_v29  ;;  %v2671_v38 = vsel %vm1452_vm1, 1.0, %v3202_v3  ;;  %v2735_v39 = vsel %vm1756_vm2, 1.0, %v3202_v3  ;;  %v1337_v40 = vadd.f32 %v2604_v33, %v3604_v46 }
 0x1aa   : > { %v1644_v42 = vadd.f32 %v2671_v38, %v1340_v32  ;;  %vm1449_vm3 = vcmp.eq.s32.totalorder %v3508_v54, %v3621_v51  ;;  %vm1753_vm4 = vcmp.eq.s32.totalorder %v3508_v54, %v1731_v13  ;;  %v2606_v43 = vsel %vm1147_vm11, 1.0, %v3202_v3 }
 0x1ab   : > { %v1402_v34 = vpop.xlane.xlu0 %1401  ;;  %v3726_v41 = vpop.xlane.xlu1 %811  ;;  %v1946_v44 = vadd.f32 %v2733_v31, %v1642_v35  ;;  %v2668_v45 = vsel %vm1449_vm3, 1.0, %v3202_v3  ;;  %v2732_v47 = vsel %vm1753_vm4, 1.0, %v3202_v3  ;;  %v1339_v46 = vadd.f32 %v2606_v43, %v3614_v48 }
 0x1ac   : > { %v1948_v49 = vadd.f32 %v2735_v39, %v1644_v42  ;;  %v1641_v52 = vadd.f32 %v2668_v45, %v1337_v40  ;;  %vm1451_vm5 = vcmp.eq.s32.totalorder %v3511_v37, %v3621_v51  ;;  %vm1755_vm6 = vcmp.eq.s32.totalorder %v3511_v37, %v1731_v13 }
 0x1ad   : > { %vm851_vm7 = vcmp.eq.s32.totalorder %v3511_v37, %v3657_v11  ;;  %vm852_vm8 = vcmp.eq.s32.totalorder %v3517_v57, %v3657_v11  ;;  %2139 = vmatprep.mubr.f32.mxu0 %v1946_v44  ;;  %v2670_v50 = vsel %vm1451_vm5, 1.0, %v3202_v3  ;;  %v2734_v53 = vsel %vm1755_vm6, 1.0, %v3202_v3 }
 0x1ae   : > { %vm1150_vm9 = vcmp.eq.s32.totalorder %v3514_v55, %v3696_v24  ;;  %2284 = vmatprep.mubr.f32.mxu1 %v1948_v49  ;;  %v1732_v48 = vadd.s32 384, %v1704_v21  ;;  %v1945_v51 = vadd.f32 %v2732_v47, %v1641_v52  ;;  %v1643_v58 = vadd.f32 %v2670_v50, %v1339_v46 }
 0x1af   : > { %v1706_v56 = vpop.xlane.xlu0 %1705  ;;  %vm1149_vm10 = vcmp.eq.s32.totalorder %v3508_v54, %v3696_v24  ;;  %vm1151_vm11 = vcmp.eq.s32.totalorder %v3511_v37, %v3696_v24  ;;  %vm1152_vm12 = vcmp.eq.s32.totalorder %v3517_v57, %v3696_v24  ;;  %v3759_v59 = vsel %vm849_vm13, 1.0, %v3202_v3  ;;  %v1100_v25 = vpop.xlane.xlu1 %1099 }
 0x1b0   : > { %v3765_v36 = vsel %vm850_vm0, 1.0, %v3202_v3  ;;  %v3771_v60 = vsel %vm851_vm7, 1.0, %v3202_v3  ;;  %v3777_v61 = vsel %vm852_vm8, 1.0, %v3202_v3  ;;  %2140 = vmatmul.mubr.f32.gmra.mxu0 %v1945_v51  ;;  %v1947_v62 = vadd.f32 %v2734_v53, %v1643_v58 }
 0x1b1   : > { %v3779_v63 = vadd.s32 128, %v1098_v22  ;;  %v3781_v0 = vadd.s32 256, %v1402_v34  ;;  %vm853_vm13 = vcmp.eq.s32.totalorder %v3508_v54, %v3726_v41  ;;  %v2609_v1 = vsel %vm1150_vm9, 1.0, %v3202_v3 }
 0x1b2   : > { %2285 = vmatmul.mubr.f32.gmra.mxu1 %v1947_v62  ;;  %v1342_v2 = vadd.f32 %v2609_v1, %v3685_v18  ;;  %vm1454_vm14 = vcmp.eq.s32.totalorder %v3514_v55, %v3698_v26  ;;  %vm1758_vm15 = vcmp.eq.s32.totalorder %v3514_v55, %v1732_v48  ;;  %v2611_v4 = vsel %vm1152_vm12, 1.0, %v3202_v3 }
 0x1b3   : > { %v2673_v5 = vsel %vm1454_vm14, 1.0, %v3202_v3  ;;  %v2737_v6 = vsel %vm1758_vm15, 1.0, %v3202_v3  ;;  %v1344_v7 = vadd.f32 %v2611_v4, %v3694_v23  ;;  %vm1456_vm0 = vcmp.eq.s32.totalorder %v3517_v57, %v3698_v26  ;;  %v1404_v8 = vpop.xlane.xlu0 %1403  ;;  %v3813_v14 = vpop.xlane.xlu1 %813 }
 0x1b4   : > { %vm854_vm1 = vcmp.eq.s32.totalorder %v3514_v55, %v3726_v41  ;;  %v1646_v9 = vadd.f32 %v2673_v5, %v1342_v2  ;;  %v2675_v10 = vsel %vm1456_vm0, 1.0, %v3202_v3  ;;  %vm1760_vm2 = vcmp.eq.s32.totalorder %v3517_v57, %v1732_v48 }
 0x1b5   : > { %v1648_v11 = vadd.f32 %v2675_v10, %v1344_v7  ;;  %v2739_v12 = vsel %vm1760_vm2, 1.0, %v3202_v3  ;;  %v2608_v13 = vsel %vm1149_vm10, 1.0, %v3202_v3  ;;  %vm1453_vm3 = vcmp.eq.s32.totalorder %v3508_v54, %v3698_v26 }
 0x1b6   : > { %v1950_v15 = vadd.f32 %v2737_v6, %v1646_v9  ;;  %v1341_v16 = vadd.f32 %v2608_v13, %v3679_v17  ;;  %v2672_v18 = vsel %vm1453_vm3, 1.0, %v3202_v3  ;;  %vm1757_vm4 = vcmp.eq.s32.totalorder %v3508_v54, %v1732_v48 }
 0x1b7   : > { %v1952_v20 = vadd.f32 %v2739_v12, %v1648_v11  ;;  %v2736_v21 = vsel %vm1757_vm4, 1.0, %v3202_v3  ;;  %v2610_v22 = vsel %vm1151_vm11, 1.0, %v3202_v3  ;;  %vm1455_vm5 = vcmp.eq.s32.totalorder %v3511_v37, %v3698_v26  ;;  %v1708_v26 = vpop.xlane.xlu0 %1707  ;;  %v1102_v32 = vpop.xlane.xlu1 %1101 }
 0x1b8   : > { %2144 = vmatprep.mubr.f32.mxu0 %v1950_v15  ;;  %v1645_v23 = vadd.f32 %v2672_v18, %v1341_v16  ;;  %v1343_v27 = vadd.f32 %v2610_v22, %v3688_v19  ;;  %v2674_v17 = vsel %vm1455_vm5, 1.0, %v3202_v3  ;;  %vm1759_vm6 = vcmp.eq.s32.totalorder %v3511_v37, %v1732_v48 }
 0x1b9   : > { %vm1153_vm7 = vcmp.eq.s32.totalorder %v3508_v54, %v3779_v63  ;;  %vm855_vm8 = vcmp.eq.s32.totalorder %v3511_v37, %v3726_v41  ;;  %vm856_vm9 = vcmp.eq.s32.totalorder %v3517_v57, %v3726_v41  ;;  %2289 = vmatprep.mubr.f32.mxu1 %v1952_v20  ;;  %v2738_v24 = vsel %vm1759_vm6, 1.0, %v3202_v3 }
 0x1ba   : > { %vm1154_vm10 = vcmp.eq.s32.totalorder %v3514_v55, %v3779_v63  ;;  %v1733_v19 = vadd.s32 384, %v1706_v56  ;;  %v1949_v28 = vadd.f32 %v2736_v21, %v1645_v23  ;;  %v1647_v29 = vadd.f32 %v2674_v17, %v1343_v27 }
 0x1bb   : > { %vm1155_vm11 = vcmp.eq.s32.totalorder %v3511_v37, %v3779_v63  ;;  %vm1156_vm12 = vcmp.eq.s32.totalorder %v3517_v57, %v3779_v63  ;;  %v3845_v30 = vsel %vm853_vm13, 1.0, %v3202_v3  ;;  %v3851_v31 = vsel %vm854_vm1, 1.0, %v3202_v3  ;;  %v1406_v47 = vpop.xlane.xlu0 %1405  ;;  %v3894_v56 = vpop.xlane.xlu1 %815 }
 0x1bc   : > { %v3854_v33 = vsel %vm855_vm8, 1.0, %v3202_v3  ;;  %v3857_v34 = vsel %vm856_vm9, 1.0, %v3202_v3  ;;  %2145 = vmatmul.mubr.f32.gmra.mxu0 %v1949_v28  ;;  %v1951_v35 = vadd.f32 %v2738_v24, %v1647_v29  ;;  %v3859_v38 = vadd.s32 128, %v1100_v25 }
 0x1bd   : > { %v3861_v39 = vadd.s32 256, %v1404_v8  ;;  %vm857_vm13 = vcmp.eq.s32.totalorder %v3508_v54, %v3813_v14  ;;  %v2613_v40 = vsel %vm1154_vm10, 1.0, %v3202_v3  ;;  %vm1458_vm14 = vcmp.eq.s32.totalorder %v3514_v55, %v3781_v0 }
 0x1be   : > { %2290 = vmatmul.mubr.f32.gmra.mxu1 %v1951_v35  ;;  %v1346_v41 = vadd.f32 %v2613_v40, %v3765_v36  ;;  %v2677_v42 = vsel %vm1458_vm14, 1.0, %v3202_v3  ;;  %vm1762_vm15 = vcmp.eq.s32.totalorder %v3514_v55, %v1733_v19  ;;  %v2615_v43 = vsel %vm1156_vm12, 1.0, %v3202_v3 }
 0x1bf   : > { %v2741_v44 = vsel %vm1762_vm15, 1.0, %v3202_v3  ;;  %v1348_v45 = vadd.f32 %v2615_v43, %v3777_v61  ;;  %vm1460_vm0 = vcmp.eq.s32.totalorder %v3517_v57, %v3781_v0  ;;  %vm1764_vm1 = vcmp.eq.s32.totalorder %v3517_v57, %v1733_v19  ;;  %v1710_v2 = vpop.xlane.xlu0 %1709  ;;  %v1104_v8 = vpop.xlane.xlu1 %1103 }
 0x1c0   : > { %vm858_vm2 = vcmp.eq.s32.totalorder %v3514_v55, %v3813_v14  ;;  %v1650_v46 = vadd.f32 %v2677_v42, %v1346_v41  ;;  %v2679_v49 = vsel %vm1460_vm0, 1.0, %v3202_v3  ;;  %v2743_v52 = vsel %vm1764_vm1, 1.0, %v3202_v3 }
 0x1c1   : > { %v1652_v50 = vadd.f32 %v2679_v49, %v1348_v45  ;;  %v2612_v53 = vsel %vm1153_vm7, 1.0, %v3202_v3  ;;  %vm1457_vm3 = vcmp.eq.s32.totalorder %v3508_v54, %v3781_v0  ;;  %vm1761_vm4 = vcmp.eq.s32.totalorder %v3508_v54, %v1733_v19 }
 0x1c2   : > { %v1954_v48 = vadd.f32 %v2741_v44, %v1650_v46  ;;  %v1345_v51 = vadd.f32 %v2612_v53, %v3759_v59  ;;  %v2676_v58 = vsel %vm1457_vm3, 1.0, %v3202_v3  ;;  %v2740_v25 = vsel %vm1761_vm4, 1.0, %v3202_v3 }
 0x1c3   : > { %v1956_v36 = vadd.f32 %v2743_v52, %v1652_v50  ;;  %v2614_v61 = vsel %vm1155_vm11, 1.0, %v3202_v3  ;;  %vm1459_vm5 = vcmp.eq.s32.totalorder %v3511_v37, %v3781_v0  ;;  %vm1763_vm6 = vcmp.eq.s32.totalorder %v3511_v37, %v1733_v19  ;;  %v1408_v21 = vpop.xlane.xlu0 %1407  ;;  %v3975_v19 = vpop.xlane.xlu1 %817 }
 0x1c4   : > { %vm859_vm7 = vcmp.eq.s32.totalorder %v3511_v37, %v3813_v14  ;;  %2149 = vmatprep.mubr.f32.mxu0 %v1954_v48  ;;  %v1649_v59 = vadd.f32 %v2676_v58, %v1345_v51  ;;  %v1347_v62 = vadd.f32 %v2614_v61, %v3771_v60  ;;  %v2678_v1 = vsel %vm1459_vm5, 1.0, %v3202_v3 }
 0x1c5   : > { %vm1157_vm8 = vcmp.eq.s32.totalorder %v3508_v54, %v3859_v38  ;;  %vm860_vm9 = vcmp.eq.s32.totalorder %v3517_v57, %v3813_v14  ;;  %2294 = vmatprep.mubr.f32.mxu1 %v1956_v36  ;;  %v1734_v63 = vadd.s32 384, %v1708_v26  ;;  %v2742_v0 = vsel %vm1763_vm6, 1.0, %v3202_v3 }
 0x1c6   : > { %vm1158_vm10 = vcmp.eq.s32.totalorder %v3514_v55, %v3859_v38  ;;  %vm1159_vm11 = vcmp.eq.s32.totalorder %v3511_v37, %v3859_v38  ;;  %v1953_v60 = vadd.f32 %v2740_v25, %v1649_v59  ;;  %v1651_v4 = vadd.f32 %v2678_v1, %v1347_v62 }
 0x1c7   : > { %vm1160_vm12 = vcmp.eq.s32.totalorder %v3517_v57, %v3859_v38  ;;  %v3925_v5 = vsel %vm857_vm13, 1.0, %v3202_v3  ;;  %v3931_v6 = vsel %vm858_vm2, 1.0, %v3202_v3  ;;  %v3937_v7 = vsel %vm859_vm7, 1.0, %v3202_v3  ;;  %v1712_v43 = vpop.xlane.xlu0 %1711  ;;  %v1106_v46 = vpop.xlane.xlu1 %1105 }
 0x1c8   : > { %v3940_v9 = vsel %vm860_vm9, 1.0, %v3202_v3  ;;  %2150 = vmatmul.mubr.f32.gmra.mxu0 %v1953_v60  ;;  %v1955_v10 = vadd.f32 %v2742_v0, %v1651_v4  ;;  %v3942_v11 = vadd.s32 128, %v1102_v32  ;;  %v3944_v12 = vadd.s32 256, %v1406_v47 }
 0x1c9   : > { %vm861_vm13 = vcmp.eq.s32.totalorder %v3508_v54, %v3894_v56  ;;  %v2617_v13 = vsel %vm1158_vm10, 1.0, %v3202_v3  ;;  %vm1462_vm14 = vcmp.eq.s32.totalorder %v3514_v55, %v3861_v39  ;;  %vm1766_vm15 = vcmp.eq.s32.totalorder %v3514_v55, %v1734_v63 }
 0x1ca   : > { %2295 = vmatmul.mubr.f32.gmra.mxu1 %v1955_v10  ;;  %vm862_vm0 = vcmp.eq.s32.totalorder %v3514_v55, %v3894_v56  ;;  %v1350_v14 = vadd.f32 %v2617_v13, %v3851_v31  ;;  %v2681_v15 = vsel %vm1462_vm14, 1.0, %v3202_v3  ;;  %v2619_v16 = vsel %vm1160_vm12, 1.0, %v3202_v3 }
 0x1cb   : > { %v2745_v18 = vsel %vm1766_vm15, 1.0, %v3202_v3  ;;  %v1352_v20 = vadd.f32 %v2619_v16, %v3857_v34  ;;  %vm1464_vm1 = vcmp.eq.s32.totalorder %v3517_v57, %v3861_v39  ;;  %vm1768_vm2 = vcmp.eq.s32.totalorder %v3517_v57, %v1734_v63  ;;  %v1410_v61 = vpop.xlane.xlu0 %1409  ;;  %v4061_v60 = vpop.xlane.xlu1 %819 }
 0x1cc   : > { %v1654_v22 = vadd.f32 %v2681_v15, %v1350_v14  ;;  %v2683_v23 = vsel %vm1464_vm1, 1.0, %v3202_v3  ;;  %v2747_v27 = vsel %vm1768_vm2, 1.0, %v3202_v3  ;;  %v2616_v17 = vsel %vm1157_vm8, 1.0, %v3202_v3 }
 0x1cd   : > { %v1656_v24 = vadd.f32 %v2683_v23, %v1352_v20  ;;  %v1349_v26 = vadd.f32 %v2616_v17, %v3845_v30  ;;  %vm1461_vm3 = vcmp.eq.s32.totalorder %v3508_v54, %v3861_v39  ;;  %vm1765_vm4 = vcmp.eq.s32.totalorder %v3508_v54, %v1734_v63 }
 0x1ce   : > { %v1958_v28 = vadd.f32 %v2745_v18, %v1654_v22  ;;  %v2680_v29 = vsel %vm1461_vm3, 1.0, %v3202_v3  ;;  %v2744_v31 = vsel %vm1765_vm4, 1.0, %v3202_v3  ;;  %v2618_v32 = vsel %vm1159_vm11, 1.0, %v3202_v3 }
 0x1cf   : > { %v1960_v34 = vadd.f32 %v2747_v27, %v1656_v24  ;;  %v1653_v35 = vadd.f32 %v2680_v29, %v1349_v26  ;;  %v1351_v30 = vadd.f32 %v2618_v32, %v3854_v33  ;;  %vm1463_vm5 = vcmp.eq.s32.totalorder %v3511_v37, %v3861_v39  ;;  %v1714_v15 = vpop.xlane.xlu0 %1713  ;;  %v1108_v27 = vpop.xlane.xlu1 %1107 }
 0x1d0   : > { %vm863_vm6 = vcmp.eq.s32.totalorder %v3511_v37, %v3894_v56  ;;  %vm864_vm7 = vcmp.eq.s32.totalorder %v3517_v57, %v3894_v56  ;;  %2154 = vmatprep.mubr.f32.mxu0 %v1958_v28  ;;  %v2682_v40 = vsel %vm1463_vm5, 1.0, %v3202_v3  ;;  %vm1767_vm8 = vcmp.eq.s32.totalorder %v3511_v37, %v1734_v63 }
 0x1d1   : > { %2299 = vmatprep.mubr.f32.mxu1 %v1960_v34  ;;  %v1735_v38 = vadd.s32 384, %v1710_v2  ;;  %v1957_v41 = vadd.f32 %v2744_v31, %v1653_v35  ;;  %v1655_v42 = vadd.f32 %v2682_v40, %v1351_v30  ;;  %v2746_v33 = vsel %vm1767_vm8, 1.0, %v3202_v3 }
 0x1d2   : > { %vm1161_vm9 = vcmp.eq.s32.totalorder %v3508_v54, %v3942_v11  ;;  %vm1162_vm10 = vcmp.eq.s32.totalorder %v3514_v55, %v3942_v11  ;;  %vm1163_vm11 = vcmp.eq.s32.totalorder %v3511_v37, %v3942_v11  ;;  %vm1164_vm12 = vcmp.eq.s32.totalorder %v3517_v57, %v3942_v11 }
 0x1d3   : > { %v4005_v39 = vsel %vm861_vm13, 1.0, %v3202_v3  ;;  %v4011_v44 = vsel %vm862_vm0, 1.0, %v3202_v3  ;;  %v4017_v45 = vsel %vm863_vm6, 1.0, %v3202_v3  ;;  %2155 = vmatmul.mubr.f32.gmra.mxu0 %v1957_v41  ;;  %v1959_v47 = vadd.f32 %v2746_v33, %v1655_v42  ;;  %v1412_v35 = vpop.xlane.xlu0 %1411 }
 0x1d4   : > { %v4023_v49 = vsel %vm864_vm7, 1.0, %v3202_v3  ;;  %v4025_v52 = vadd.s32 128, %v1104_v8  ;;  %v4027_v50 = vadd.s32 256, %v1408_v21  ;;  %vm865_vm13 = vcmp.eq.s32.totalorder %v3508_v54, %v3975_v19 }
 0x1d5   : > { %2300 = vmatmul.mubr.f32.gmra.mxu1 %v1959_v47  ;;  %v2621_v53 = vsel %vm1162_vm10, 1.0, %v3202_v3  ;;  %vm1466_vm14 = vcmp.eq.s32.totalorder %v3514_v55, %v3944_v12  ;;  %vm1770_vm15 = vcmp.eq.s32.totalorder %v3514_v55, %v1735_v38  ;;  %v2623_v48 = vsel %vm1164_vm12, 1.0, %v3202_v3 }
 0x1d6   : > { %vm866_vm0 = vcmp.eq.s32.totalorder %v3514_v55, %v3975_v19  ;;  %v1354_v56 = vadd.f32 %v2621_v53, %v3931_v6  ;;  %v2685_v51 = vsel %vm1466_vm14, 1.0, %v3202_v3  ;;  %v2749_v58 = vsel %vm1770_vm15, 1.0, %v3202_v3 }
 0x1d7   : > { %v1356_v25 = vadd.f32 %v2623_v48, %v3940_v9  ;;  %vm1468_vm1 = vcmp.eq.s32.totalorder %v3517_v57, %v3944_v12  ;;  %vm1772_vm2 = vcmp.eq.s32.totalorder %v3517_v57, %v1735_v38  ;;  %v2620_v36 = vsel %vm1161_vm9, 1.0, %v3202_v3 }
 0x1d8   : > { %v1658_v59 = vadd.f32 %v2685_v51, %v1354_v56  ;;  %v2687_v62 = vsel %vm1468_vm1, 1.0, %v3202_v3  ;;  %v2751_v1 = vsel %vm1772_vm2, 1.0, %v3202_v3  ;;  %v1353_v63 = vadd.f32 %v2620_v36, %v3925_v5  ;;  %v1716_v56 = vpop.xlane.xlu0 %1715 }
 0x1d9   : > { %vm1165_vm3 = vcmp.eq.s32.totalorder %v3508_v54, %v4025_v52  ;;  %v1660_v0 = vadd.f32 %v2687_v62, %v1356_v25  ;;  %vm1465_vm4 = vcmp.eq.s32.totalorder %v3508_v54, %v3944_v12  ;;  %vm1769_vm5 = vcmp.eq.s32.totalorder %v3508_v54, %v1735_v38 }
 0x1da   : > { %v2622_v2 = vsel %vm1163_vm11, 1.0, %v3202_v3  ;;  %v1962_v4 = vadd.f32 %v2749_v58, %v1658_v59  ;;  %v2684_v6 = vsel %vm1465_vm4, 1.0, %v3202_v3  ;;  %v2748_v5 = vsel %vm1769_vm5, 1.0, %v3202_v3 }
 0x1db   : > { %v1355_v8 = vadd.f32 %v2622_v2, %v3937_v7  ;;  %v1964_v9 = vadd.f32 %v2751_v1, %v1660_v0  ;;  %v1657_v10 = vadd.f32 %v2684_v6, %v1353_v63  ;;  %vm1467_vm6 = vcmp.eq.s32.totalorder %v3511_v37, %v3944_v12 }
 0x1dc   : > { %vm1771_vm7 = vcmp.eq.s32.totalorder %v3511_v37, %v1735_v38  ;;  %vm867_vm8 = vcmp.eq.s32.totalorder %v3511_v37, %v3975_v19  ;;  %vm868_vm9 = vcmp.eq.s32.totalorder %v3517_v57, %v3975_v19  ;;  %2159 = vmatprep.mubr.f32.mxu0 %v1962_v4  ;;  %v2686_v11 = vsel %vm1467_vm6, 1.0, %v3202_v3 }
 0x1dd   : > { %v2750_v13 = vsel %vm1771_vm7, 1.0, %v3202_v3  ;;  %vm1166_vm10 = vcmp.eq.s32.totalorder %v3514_v55, %v4025_v52  ;;  %2304 = vmatprep.mubr.f32.mxu1 %v1964_v9  ;;  %v1736_v7 = vadd.s32 384, %v1712_v43  ;;  %v1961_v14 = vadd.f32 %v2748_v5, %v1657_v10  ;;  %v4138_v43 = vpop.xlane.xlu1 %821  ;;  %v1414_v10 = vpop.xlane.xlu0 %1413 }
 0x1de   : > { %v1659_v12 = vadd.f32 %v2686_v11, %v1355_v8  ;;  %vm1167_vm11 = vcmp.eq.s32.totalorder %v3511_v37, %v4025_v52  ;;  %vm1168_vm12 = vcmp.eq.s32.totalorder %v3517_v57, %v4025_v52  ;;  %v4085_v16 = vsel %vm865_vm13, 1.0, %v3202_v3 }
 0x1df   : > { %v4091_v18 = vsel %vm866_vm0, 1.0, %v3202_v3  ;;  %v4094_v20 = vsel %vm867_vm8, 1.0, %v3202_v3  ;;  %v4097_v21 = vsel %vm868_vm9, 1.0, %v3202_v3  ;;  %2160 = vmatmul.mubr.f32.gmra.mxu0 %v1961_v14  ;;  %v4099_v23 = vadd.s32 128, %v1106_v46 }
 0x1e0   : > { %v1963_v22 = vadd.f32 %v2750_v13, %v1659_v12  ;;  %v4101_v17 = vadd.s32 256, %v1410_v61  ;;  %vm869_vm13 = vcmp.eq.s32.totalorder %v3508_v54, %v4061_v60  ;;  %vm870_vm14 = vcmp.eq.s32.totalorder %v3514_v55, %v4061_v60 }
 0x1e1   : > { %v2625_v24 = vsel %vm1166_vm10, 1.0, %v3202_v3  ;;  %vm1470_vm15 = vcmp.eq.s32.totalorder %v3514_v55, %v4027_v50  ;;  %vm1774_vm0 = vcmp.eq.s32.totalorder %v3514_v55, %v1736_v7  ;;  %v2627_v19 = vsel %vm1168_vm12, 1.0, %v3202_v3  ;;  %v1110_v1 = vpop.xlane.xlu1 %1109 }
 0x1e2   : > { %2305 = vmatmul.mubr.f32.gmra.mxu1 %v1963_v22  ;;  %v1358_v26 = vadd.f32 %v2625_v24, %v4011_v44  ;;  %v2689_v28 = vsel %vm1470_vm15, 1.0, %v3202_v3  ;;  %v2753_v29 = vsel %vm1774_vm0, 1.0, %v3202_v3  ;;  %v1360_v31 = vadd.f32 %v2627_v19, %v4023_v49  ;;  %v1718_v19 = vpop.xlane.xlu0 %1717 }
 0x1e3   : > { %vm1472_vm1 = vcmp.eq.s32.totalorder %v3517_v57, %v4027_v50  ;;  %vm871_vm2 = vcmp.eq.s32.totalorder %v3511_v37, %v4061_v60  ;;  %vm1776_vm4 = vcmp.eq.s32.totalorder %v3517_v57, %v1736_v7  ;;  %v2624_v38 = vsel %vm1165_vm3, 1.0, %v3202_v3 }
 0x1e4   : > { %v1662_v32 = vadd.f32 %v2689_v28, %v1358_v26  ;;  %v2691_v34 = vsel %vm1472_vm1, 1.0, %v3202_v3  ;;  %v2755_v40 = vsel %vm1776_vm4, 1.0, %v3202_v3  ;;  %vm1469_vm5 = vcmp.eq.s32.totalorder %v3508_v54, %v4027_v50 }
 0x1e5   : > { %v1664_v30 = vadd.f32 %v2691_v34, %v1360_v31  ;;  %v1357_v42 = vadd.f32 %v2624_v38, %v4005_v39  ;;  %v2688_v33 = vsel %vm1469_vm5, 1.0, %v3202_v3  ;;  %vm1773_vm6 = vcmp.eq.s32.totalorder %v3508_v54, %v1736_v7 }
 0x1e6   : > { %v1966_v41 = vadd.f32 %v2753_v29, %v1662_v32  ;;  %v2752_v47 = vsel %vm1773_vm6, 1.0, %v3202_v3  ;;  %v2626_v46 = vsel %vm1167_vm11, 1.0, %v3202_v3  ;;  %vm1471_vm3 = vcmp.eq.s32.totalorder %v3511_v37, %v4027_v50 }
 0x1e7   : > { %v1968_v44 = vadd.f32 %v2755_v40, %v1664_v30  ;;  %v1661_v49 = vadd.f32 %v2688_v33, %v1357_v42  ;;  %v1359_v39 = vadd.f32 %v2626_v46, %v4017_v45  ;;  %v2690_v53 = vsel %vm1471_vm3, 1.0, %v3202_v3 }
 0x1e8   : > { %2164 = vmatprep.mubr.f32.mxu0 %v1966_v41  ;;  %vm1775_vm7 = vcmp.eq.s32.totalorder %v3511_v37, %v1736_v7  ;;  %vm1169_vm8 = vcmp.eq.s32.totalorder %v3508_v54, %v4099_v23  ;;  %vm1170_vm9 = vcmp.eq.s32.totalorder %v3514_v55, %v4099_v23  ;;  %vm872_vm10 = vcmp.eq.s32.totalorder %v3517_v57, %v4061_v60 }
 0x1e9   : > { %2309 = vmatprep.mubr.f32.mxu1 %v1968_v44  ;;  %v2754_v52 = vsel %vm1775_vm7, 1.0, %v3202_v3  ;;  %vm1171_vm11 = vcmp.eq.s32.totalorder %v3511_v37, %v4099_v23  ;;  %v1737_v45 = vadd.s32 384, %v1714_v15  ;;  %v1965_v50 = vadd.f32 %v2752_v47, %v1661_v49 }
 0x1ea   : > { %v1663_v48 = vadd.f32 %v2690_v53, %v1359_v39  ;;  %vm1172_vm12 = vcmp.eq.s32.totalorder %v3517_v57, %v4099_v23  ;;  %v4165_v51 = vsel %vm869_vm13, 1.0, %v3202_v3  ;;  %v4171_v58 = vsel %vm870_vm14, 1.0, %v3202_v3  ;;  %v1416_v53 = vpop.xlane.xlu0 %1415 }
 0x1eb   : > { %v4177_v25 = vsel %vm871_vm2, 1.0, %v3202_v3  ;;  %v4180_v36 = vsel %vm872_vm10, 1.0, %v3202_v3  ;;  %2165 = vmatmul.mubr.f32.gmra.mxu0 %v1965_v50  ;;  %v4182_v59 = vadd.s32 128, %v1108_v27  ;;  %v4184_v62 = vadd.s32 256, %v1412_v35 }
 0x1ec   : > { %v1967_v61 = vadd.f32 %v2754_v52, %v1663_v48  ;;  %vm873_vm13 = vcmp.eq.s32.totalorder %v3508_v54, %v4138_v43  ;;  %vm874_vm14 = vcmp.eq.s32.totalorder %v3514_v55, %v4138_v43  ;;  %v2629_v63 = vsel %vm1170_vm9, 1.0, %v3202_v3 }
 0x1ed   : > { %vm1474_vm15 = vcmp.eq.s32.totalorder %v3514_v55, %v4101_v17  ;;  %v1362_v0 = vadd.f32 %v2629_v63, %v4091_v18  ;;  %vm1778_vm0 = vcmp.eq.s32.totalorder %v3514_v55, %v1737_v45  ;;  %v2631_v60 = vsel %vm1172_vm12, 1.0, %v3202_v3  ;;  %v4222_v18 = vpop.xlane.xlu1 %823 }
 0x1ee   : > { %2310 = vmatmul.mubr.f32.gmra.mxu1 %v1967_v61  ;;  %v2693_v2 = vsel %vm1474_vm15, 1.0, %v3202_v3  ;;  %v2757_v4 = vsel %vm1778_vm0, 1.0, %v3202_v3  ;;  %v1364_v6 = vadd.f32 %v2631_v60, %v4097_v21  ;;  %vm1476_vm1 = vcmp.eq.s32.totalorder %v3517_v57, %v4101_v17  ;;  %v1720_v60 = vpop.xlane.xlu0 %1719 }
 0x1ef   : > { %vm1780_vm2 = vcmp.eq.s32.totalorder %v3517_v57, %v1737_v45  ;;  %vm875_vm4 = vcmp.eq.s32.totalorder %v3511_v37, %v4138_v43  ;;  %v1666_v5 = vadd.f32 %v2693_v2, %v1362_v0  ;;  %v2695_v8 = vsel %vm1476_vm1, 1.0, %v3202_v3 }
 0x1f0   : > { %v2759_v9 = vsel %vm1780_vm2, 1.0, %v3202_v3  ;;  %v1668_v11 = vadd.f32 %v2695_v8, %v1364_v6  ;;  %v2628_v13 = vsel %vm1169_vm8, 1.0, %v3202_v3  ;;  %vm1473_vm5 = vcmp.eq.s32.totalorder %v3508_v54, %v4101_v17 }
 0x1f1   : > { %vm1777_vm6 = vcmp.eq.s32.totalorder %v3508_v54, %v1737_v45  ;;  %v1970_v7 = vadd.f32 %v2757_v4, %v1666_v5  ;;  %v1361_v14 = vadd.f32 %v2628_v13, %v4085_v16  ;;  %v2692_v12 = vsel %vm1473_vm5, 1.0, %v3202_v3  ;;  %v1112_v40 = vpop.xlane.xlu1 %1111 }
 0x1f2   : > { %v2756_v15 = vsel %vm1777_vm6, 1.0, %v3202_v3  ;;  %v1972_v21 = vadd.f32 %v2759_v9, %v1668_v11  ;;  %v2630_v22 = vsel %vm1171_vm11, 1.0, %v3202_v3  ;;  %vm1475_vm3 = vcmp.eq.s32.totalorder %v3511_v37, %v4101_v17 }
 0x1f3   : > { %vm1779_vm7 = vcmp.eq.s32.totalorder %v3511_v37, %v1737_v45  ;;  %vm876_vm8 = vcmp.eq.s32.totalorder %v3517_v57, %v4138_v43  ;;  %2169 = vmatprep.mubr.f32.mxu0 %v1970_v7  ;;  %v1665_v16 = vadd.f32 %v2692_v12, %v1361_v14  ;;  %v1363_v27 = vadd.f32 %v2630_v22, %v4094_v20 }
 0x1f4   : > { %v2694_v24 = vsel %vm1475_vm3, 1.0, %v3202_v3  ;;  %vm1173_vm9 = vcmp.eq.s32.totalorder %v3508_v54, %v4182_v59  ;;  %vm1174_vm10 = vcmp.eq.s32.totalorder %v3514_v55, %v4182_v59  ;;  %2314 = vmatprep.mubr.f32.mxu1 %v1972_v21  ;;  %v1738_v23 = vadd.s32 384, %v1716_v56 }
 0x1f5   : > { %v2758_v17 = vsel %vm1779_vm7, 1.0, %v3202_v3  ;;  %vm1175_vm11 = vcmp.eq.s32.totalorder %v3511_v37, %v4182_v59  ;;  %vm1176_vm12 = vcmp.eq.s32.totalorder %v3517_v57, %v4182_v59  ;;  %v1969_v26 = vadd.f32 %v2756_v15, %v1665_v16 }
 0x1f6   : > { %v1667_v20 = vadd.f32 %v2694_v24, %v1363_v27  ;;  %v4248_v28 = vsel %vm873_vm13, 1.0, %v3202_v3  ;;  %v4254_v29 = vsel %vm874_vm14, 1.0, %v3202_v3  ;;  %v4260_v31 = vsel %vm875_vm4, 1.0, %v3202_v3 }
 0x1f7   : > { %v4266_v32 = vsel %vm876_vm8, 1.0, %v3202_v3  ;;  %2170 = vmatmul.mubr.f32.gmra.mxu0 %v1969_v26  ;;  %v4268_v35 = vadd.s32 128, %v1110_v1  ;;  %v4270_v30 = vadd.s32 256, %v1414_v10  ;;  %vm877_vm13 = vcmp.eq.s32.totalorder %v3508_v54, %v4222_v18 }
 0x1f8   : > { %v1971_v34 = vadd.f32 %v2758_v17, %v1667_v20  ;;  %vm878_vm14 = vcmp.eq.s32.totalorder %v3514_v55, %v4222_v18  ;;  %v2633_v38 = vsel %vm1174_vm10, 1.0, %v3202_v3  ;;  %vm1478_vm15 = vcmp.eq.s32.totalorder %v3514_v55, %v4184_v62 }
 0x1f9   : > { %vm1782_vm0 = vcmp.eq.s32.totalorder %v3514_v55, %v1738_v23  ;;  %vm879_vm1 = vcmp.eq.s32.totalorder %v3511_v37, %v4222_v18  ;;  %v1366_v41 = vadd.f32 %v2633_v38, %v4171_v58  ;;  %v2697_v42 = vsel %vm1478_vm15, 1.0, %v3202_v3 }
 0x1fa   : > { %2315 = vmatmul.mubr.f32.gmra.mxu1 %v1971_v34  ;;  %v2635_v33 = vsel %vm1176_vm12, 1.0, %v3202_v3  ;;  %v2761_v43 = vsel %vm1782_vm0, 1.0, %v3202_v3  ;;  %vm1480_vm2 = vcmp.eq.s32.totalorder %v3517_v57, %v4184_v62  ;;  %vm1784_vm4 = vcmp.eq.s32.totalorder %v3517_v57, %v1738_v23 }
 0x1fb   : > { %v1368_v44 = vadd.f32 %v2635_v33, %v4180_v36  ;;  %v1670_v47 = vadd.f32 %v2697_v42, %v1366_v41  ;;  %v2699_v46 = vsel %vm1480_vm2, 1.0, %v3202_v3  ;;  %v2763_v49 = vsel %vm1784_vm4, 1.0, %v3202_v3  ;;  %v4312_v36 = vpop.xlane.xlu1 %825 }
 0x1fc   : > { %v2632_v39 = vsel %vm1173_vm9, 1.0, %v3202_v3  ;;  %vm1477_vm5 = vcmp.eq.s32.totalorder %v3508_v54, %v4184_v62  ;;  %vm1781_vm6 = vcmp.eq.s32.totalorder %v3508_v54, %v1738_v23  ;;  %v2634_v58 = vsel %vm1175_vm11, 1.0, %v3202_v3 }
 0x1fd   : > { %v1672_v52 = vadd.f32 %v2699_v46, %v1368_v44  ;;  %v1365_v45 = vadd.f32 %v2632_v39, %v4165_v51  ;;  %v1974_v50 = vadd.f32 %v2761_v43, %v1670_v47  ;;  %v2696_v48 = vsel %vm1477_vm5, 1.0, %v3202_v3 }
 0x1fe   : > { %v2760_v56 = vsel %vm1781_vm6, 1.0, %v3202_v3  ;;  %v1367_v51 = vadd.f32 %v2634_v58, %v4177_v25  ;;  %vm1479_vm3 = vcmp.eq.s32.totalorder %v3511_v37, %v4184_v62  ;;  %vm1177_vm7 = vcmp.eq.s32.totalorder %v3508_v54, %v4268_v35 }
 0x1ff   : > { %v1976_v61 = vadd.f32 %v2763_v49, %v1672_v52  ;;  %v1669_v1 = vadd.f32 %v2696_v48, %v1365_v45  ;;  %vm880_vm8 = vcmp.eq.s32.totalorder %v3517_v57, %v4222_v18  ;;  %2174 = vmatprep.mubr.f32.mxu0 %v1974_v50  ;;  %v2698_v63 = vsel %vm1479_vm3, 1.0, %v3202_v3  ;;  %v1114_v11 = vpop.xlane.xlu1 %1113 }
 0x200   : > { %vm1783_vm9 = vcmp.eq.s32.totalorder %v3511_v37, %v1738_v23  ;;  %v1739_v59 = vadd.s32 384, %v1718_v19  ;;  %v1671_v2 = vadd.f32 %v2698_v63, %v1367_v51  ;;  %vm1178_vm10 = vcmp.eq.s32.totalorder %v3514_v55, %v4268_v35  ;;  %v1418_v23 = vpop.xlane.xlu0 %1417 }
 0x201   : > { %2319 = vmatprep.mubr.f32.mxu1 %v1976_v61  ;;  %v1973_v0 = vadd.f32 %v2760_v56, %v1669_v1  ;;  %v2762_v25 = vsel %vm1783_vm9, 1.0, %v3202_v3  ;;  %vm1179_vm11 = vcmp.eq.s32.totalorder %v3511_v37, %v4268_v35  ;;  %vm1180_vm12 = vcmp.eq.s32.totalorder %v3517_v57, %v4268_v35 }
 0x202   : > { %v4334_v62 = vsel %vm877_vm13, 1.0, %v3202_v3  ;;  %v4340_v4 = vsel %vm878_vm14, 1.0, %v3202_v3  ;;  %v4346_v6 = vsel %vm879_vm1, 1.0, %v3202_v3  ;;  %v4352_v5 = vsel %vm880_vm8, 1.0, %v3202_v3 }
 0x203   : > { %2175 = vmatmul.mubr.f32.gmra.mxu0 %v1973_v0  ;;  %v1975_v8 = vadd.f32 %v2762_v25, %v1671_v2  ;;  %v4354_v9 = vadd.s32 128, %v1112_v40  ;;  %v4356_v10 = vadd.s32 256, %v1416_v53  ;;  %vm881_vm13 = vcmp.eq.s32.totalorder %v3508_v54, %v4312_v36 }
 0x204   : > { %vm882_vm14 = vcmp.eq.s32.totalorder %v3514_v55, %v4312_v36  ;;  %v2637_v13 = vsel %vm1178_vm10, 1.0, %v3202_v3  ;;  %vm1482_vm15 = vcmp.eq.s32.totalorder %v3514_v55, %v4270_v30  ;;  %vm1786_vm0 = vcmp.eq.s32.totalorder %v3514_v55, %v1739_v59  ;;  %v1722_v44 = vpop.xlane.xlu0 %1721 }
 0x205   : > { %2320 = vmatmul.mubr.f32.gmra.mxu1 %v1975_v8  ;;  %v2639_v7 = vsel %vm1180_vm12, 1.0, %v3202_v3  ;;  %vm883_vm1 = vcmp.eq.s32.totalorder %v3511_v37, %v4312_v36  ;;  %v1370_v14 = vadd.f32 %v2637_v13, %v4254_v29  ;;  %v2701_v12 = vsel %vm1482_vm15, 1.0, %v3202_v3 }
 0x206   : > { %v2765_v15 = vsel %vm1786_vm0, 1.0, %v3202_v3  ;;  %v1372_v18 = vadd.f32 %v2639_v7, %v4266_v32  ;;  %vm1484_vm2 = vcmp.eq.s32.totalorder %v3517_v57, %v4270_v30  ;;  %vm1788_vm4 = vcmp.eq.s32.totalorder %v3517_v57, %v1739_v59  ;;  %v4401_v32 = vpop.xlane.xlu1 %827 }
 0x207   : > { %v2636_v21 = vsel %vm1177_vm7, 1.0, %v3202_v3  ;;  %v1674_v22 = vadd.f32 %v2701_v12, %v1370_v14  ;;  %v2703_v16 = vsel %vm1484_vm2, 1.0, %v3202_v3  ;;  %v2767_v27 = vsel %vm1788_vm4, 1.0, %v3202_v3 }
 0x208   : > { %v1369_v24 = vadd.f32 %v2636_v21, %v4248_v28  ;;  %vm1181_vm5 = vcmp.eq.s32.totalorder %v3508_v54, %v4354_v9  ;;  %v1676_v17 = vadd.f32 %v2703_v16, %v1372_v18  ;;  %vm1481_vm6 = vcmp.eq.s32.totalorder %v3508_v54, %v4270_v30 }
 0x209   : > { %vm1785_vm3 = vcmp.eq.s32.totalorder %v3508_v54, %v1739_v59  ;;  %v2638_v26 = vsel %vm1179_vm11, 1.0, %v3202_v3  ;;  %v1978_v20 = vadd.f32 %v2765_v15, %v1674_v22  ;;  %v2700_v19 = vsel %vm1481_vm6, 1.0, %v3202_v3 }
 0x20a   : > { %v2764_v28 = vsel %vm1785_vm3, 1.0, %v3202_v3  ;;  %v1371_v29 = vadd.f32 %v2638_v26, %v4260_v31  ;;  %v1980_v34 = vadd.f32 %v2767_v27, %v1676_v17  ;;  %v1673_v40 = vadd.f32 %v2700_v19, %v1369_v24  ;;  %v1116_v52 = vpop.xlane.xlu1 %1115 }
 0x20b   : > { %vm1483_vm7 = vcmp.eq.s32.totalorder %v3511_v37, %v4270_v30  ;;  %vm1787_vm8 = vcmp.eq.s32.totalorder %v3511_v37, %v1739_v59  ;;  %vm1182_vm9 = vcmp.eq.s32.totalorder %v3514_v55, %v4354_v9  ;;  %vm884_vm10 = vcmp.eq.s32.totalorder %v3517_v57, %v4312_v36  ;;  %2179 = vmatprep.mubr.f32.mxu0 %v1978_v20  ;;  %v1420_v59 = vpop.xlane.xlu0 %1419 }
 0x20c   : > { %v2702_v35 = vsel %vm1483_vm7, 1.0, %v3202_v3  ;;  %v2766_v31 = vsel %vm1787_vm8, 1.0, %v3202_v3  ;;  %vm1183_vm11 = vcmp.eq.s32.totalorder %v3511_v37, %v4354_v9  ;;  %2324 = vmatprep.mubr.f32.mxu1 %v1980_v34  ;;  %v1740_v38 = vadd.s32 384, %v1720_v60 }
 0x20d   : > { %v1977_v41 = vadd.f32 %v2764_v28, %v1673_v40  ;;  %v1675_v30 = vadd.f32 %v2702_v35, %v1371_v29  ;;  %vm1184_vm12 = vcmp.eq.s32.totalorder %v3517_v57, %v4354_v9  ;;  %v4420_v42 = vsel %vm881_vm13, 1.0, %v3202_v3 }
 0x20e   : > { %v4426_v33 = vsel %vm882_vm14, 1.0, %v3202_v3  ;;  %v4432_v43 = vsel %vm883_vm1, 1.0, %v3202_v3  ;;  %v4435_v47 = vsel %vm884_vm10, 1.0, %v3202_v3  ;;  %v4437_v49 = vadd.s32 128, %v1114_v11  ;;  %v4485_v8 = vpop.xlane.xlu1 %829 }
 0x20f   : > { %2180 = vmatmul.mubr.f32.gmra.mxu0 %v1977_v41  ;;  %v1979_v46 = vadd.f32 %v2766_v31, %v1675_v30  ;;  %v4439_v39 = vadd.s32 256, %v1418_v23  ;;  %vm885_vm13 = vcmp.eq.s32.totalorder %v3508_v54, %v4401_v32  ;;  %vm886_vm14 = vcmp.eq.s32.totalorder %v3514_v55, %v4401_v32  ;;  %v1724_v21 = vpop.xlane.xlu0 %1723 }
 0x210   : > { %vm887_vm15 = vcmp.eq.s32.totalorder %v3511_v37, %v4401_v32  ;;  %v2641_v53 = vsel %vm1182_vm9, 1.0, %v3202_v3  ;;  %vm1486_vm0 = vcmp.eq.s32.totalorder %v3514_v55, %v4356_v10  ;;  %vm1790_vm1 = vcmp.eq.s32.totalorder %v3514_v55, %v1740_v38 }
 0x211   : > { %2325 = vmatmul.mubr.f32.gmra.mxu1 %v1979_v46  ;;  %v1374_v45 = vadd.f32 %v2641_v53, %v4340_v4  ;;  %v2643_v50 = vsel %vm1184_vm12, 1.0, %v3202_v3  ;;  %v2705_v48 = vsel %vm1486_vm0, 1.0, %v3202_v3  ;;  %v2769_v56 = vsel %vm1790_vm1, 1.0, %v3202_v3 }
 0x212   : > { %v1376_v58 = vadd.f32 %v2643_v50, %v4352_v5  ;;  %vm1488_vm2 = vcmp.eq.s32.totalorder %v3517_v57, %v4356_v10  ;;  %vm888_vm4 = vcmp.eq.s32.totalorder %v3517_v57, %v4401_v32  ;;  %vm1792_vm6 = vcmp.eq.s32.totalorder %v3517_v57, %v1740_v38  ;;  %v1118_v23 = vpop.xlane.xlu1 %1117 }
 0x213   : > { %v1678_v36 = vadd.f32 %v2705_v48, %v1374_v45  ;;  %v2707_v61 = vsel %vm1488_vm2, 1.0, %v3202_v3  ;;  %v2771_v51 = vsel %vm1792_vm6, 1.0, %v3202_v3  ;;  %v2640_v63 = vsel %vm1181_vm5, 1.0, %v3202_v3  ;;  %v1422_v31 = vpop.xlane.xlu0 %1421 }
 0x214   : > { %v1680_v1 = vadd.f32 %v2707_v61, %v1376_v58  ;;  %vm1485_vm3 = vcmp.eq.s32.totalorder %v3508_v54, %v4356_v10  ;;  %v1373_v2 = vadd.f32 %v2640_v63, %v4334_v62  ;;  %vm1789_vm7 = vcmp.eq.s32.totalorder %v3508_v54, %v1740_v38 }
 0x215   : > { %v1982_v0 = vadd.f32 %v2769_v56, %v1678_v36  ;;  %v2704_v25 = vsel %vm1485_vm3, 1.0, %v3202_v3  ;;  %v2768_v4 = vsel %vm1789_vm7, 1.0, %v3202_v3  ;;  %v2642_v5 = vsel %vm1183_vm11, 1.0, %v3202_v3 }
 0x216   : > { %v1984_v60 = vadd.f32 %v2771_v51, %v1680_v1  ;;  %vm1487_vm5 = vcmp.eq.s32.totalorder %v3511_v37, %v4356_v10  ;;  %v1677_v11 = vadd.f32 %v2704_v25, %v1373_v2  ;;  %v1375_v62 = vadd.f32 %v2642_v5, %v4346_v6  ;;  %v4574_v46 = vpop.xlane.xlu1 %831 }
 0x217   : > { %2184 = vmatprep.mubr.f32.mxu0 %v1982_v0  ;;  %v2706_v13 = vsel %vm1487_vm5, 1.0, %v3202_v3  ;;  %vm1791_vm8 = vcmp.eq.s32.totalorder %v3511_v37, %v1740_v38  ;;  %vm1185_vm9 = vcmp.eq.s32.totalorder %v3508_v54, %v4437_v49  ;;  %vm1186_vm10 = vcmp.eq.s32.totalorder %v3514_v55, %v4437_v49  ;;  %v1726_v1 = vpop.xlane.xlu0 %1725 }
 0x218   : > { %vm1187_vm11 = vcmp.eq.s32.totalorder %v3511_v37, %v4437_v49  ;;  %2329 = vmatprep.mubr.f32.mxu1 %v1984_v60  ;;  %v2770_v9 = vsel %vm1791_vm8, 1.0, %v3202_v3  ;;  %vm1188_vm12 = vcmp.eq.s32.totalorder %v3517_v57, %v4437_v49  ;;  %v1741_v6 = vadd.s32 384, %v1722_v44 }
 0x219   : > { %v1981_v10 = vadd.f32 %v2768_v4, %v1677_v11  ;;  %v1679_v7 = vadd.f32 %v2706_v13, %v1375_v62  ;;  %v4503_v14 = vsel %vm885_vm13, 1.0, %v3202_v3  ;;  %v4509_v12 = vsel %vm886_vm14, 1.0, %v3202_v3 }
 0x21a   : > { %v4515_v15 = vsel %vm887_vm15, 1.0, %v3202_v3  ;;  %v4521_v18 = vsel %vm888_vm4, 1.0, %v3202_v3  ;;  %v4523_v16 = vadd.s32 128, %v1116_v52  ;;  %v4525_v27 = vadd.s32 256, %v1420_v59  ;;  %v1120_v59 = vpop.xlane.xlu1 %1119 }
 0x21b   : > { %2185 = vmatmul.mubr.f32.gmra.mxu0 %v1981_v10  ;;  %v1983_v22 = vadd.f32 %v2770_v9, %v1679_v7  ;;  %vm889_vm13 = vcmp.eq.s32.totalorder %v3508_v54, %v4485_v8  ;;  %vm890_vm14 = vcmp.eq.s32.totalorder %v3514_v55, %v4485_v8  ;;  %vm891_vm15 = vcmp.eq.s32.totalorder %v3511_v37, %v4485_v8  ;;  %v1424_v10 = vpop.xlane.xlu0 %1423 }
 0x21c   : > { %v2645_v24 = vsel %vm1186_vm10, 1.0, %v3202_v3  ;;  %vm1490_vm0 = vcmp.eq.s32.totalorder %v3514_v55, %v4439_v39  ;;  %vm1794_vm1 = vcmp.eq.s32.totalorder %v3514_v55, %v1741_v6  ;;  %v2647_v20 = vsel %vm1188_vm12, 1.0, %v3202_v3 }
 0x21d   : > { %2330 = vmatmul.mubr.f32.gmra.mxu1 %v1983_v22  ;;  %v1378_v17 = vadd.f32 %v2645_v24, %v4426_v33  ;;  %v2709_v26 = vsel %vm1490_vm0, 1.0, %v3202_v3  ;;  %v2773_v19 = vsel %vm1794_vm1, 1.0, %v3202_v3  ;;  %v1380_v28 = vadd.f32 %v2647_v20, %v4435_v47 }
 0x21e   : > { %vm1492_vm2 = vcmp.eq.s32.totalorder %v3517_v57, %v4439_v39  ;;  %vm1796_vm4 = vcmp.eq.s32.totalorder %v3517_v57, %v1741_v6  ;;  %vm1190_vm6 = vcmp.eq.s32.totalorder %v3514_v55, %v4523_v16  ;;  %vm1189_vm3 = vcmp.eq.s32.totalorder %v3508_v54, %v4523_v16 }
 0x21f   : > { %v1682_v29 = vadd.f32 %v2709_v26, %v1378_v17  ;;  %v2711_v32 = vsel %vm1492_vm2, 1.0, %v3202_v3  ;;  %v2775_v34 = vsel %vm1796_vm4, 1.0, %v3202_v3  ;;  %v2644_v35 = vsel %vm1185_vm9, 1.0, %v3202_v3 }
 0x220   : > { %v1684_v40 = vadd.f32 %v2711_v32, %v1380_v28  ;;  %vm1489_vm7 = vcmp.eq.s32.totalorder %v3508_v54, %v4439_v39  ;;  %vm1793_vm5 = vcmp.eq.s32.totalorder %v3508_v54, %v1741_v6  ;;  %v1377_v41 = vadd.f32 %v2644_v35, %v4420_v42 }
 0x221   : > { %v1986_v38 = vadd.f32 %v2773_v19, %v1682_v29  ;;  %v2708_v30 = vsel %vm1489_vm7, 1.0, %v3202_v3  ;;  %v2772_v33 = vsel %vm1793_vm5, 1.0, %v3202_v3  ;;  %v2646_v47 = vsel %vm1187_vm11, 1.0, %v3202_v3 }
 0x222   : > { %v1988_v44 = vadd.f32 %v2775_v34, %v1684_v40  ;;  %vm1491_vm8 = vcmp.eq.s32.totalorder %v3511_v37, %v4439_v39  ;;  %vm1795_vm9 = vcmp.eq.s32.totalorder %v3511_v37, %v1741_v6  ;;  %vm892_vm10 = vcmp.eq.s32.totalorder %v3517_v57, %v4485_v8 }
 0x223   : > { %2189 = vmatprep.mubr.f32.mxu0 %v1986_v38  ;;  %v1681_v42 = vadd.f32 %v2708_v30, %v1377_v41  ;;  %v1379_v53 = vadd.f32 %v2646_v47, %v4432_v43  ;;  %v2710_v52 = vsel %vm1491_vm8, 1.0, %v3202_v3  ;;  %vm1191_vm12 = vcmp.eq.s32.totalorder %v3511_v37, %v4523_v16 }
 0x224   : > { %2334 = vmatprep.mubr.f32.mxu1 %v1988_v44  ;;  %v1742_v49 = vadd.s32 384, %v1724_v21  ;;  %v2774_v39 = vsel %vm1795_vm9, 1.0, %v3202_v3  ;;  %v4583_v45 = vadd.s32 128, %v1118_v23  ;;  %vm1192_vm11 = vcmp.eq.s32.totalorder %v3517_v57, %v4523_v16  ;;  %v1728_v23 = vpop.xlane.xlu1 %1727 }
 0x225   : > { %v4591_v50 = vsel %vm889_vm13, 1.0, %v3202_v3  ;;  %v1985_v43 = vadd.f32 %v2772_v33, %v1681_v42  ;;  %v1683_v48 = vadd.f32 %v2710_v52, %v1379_v53  ;;  %v4597_v56 = vsel %vm890_vm14, 1.0, %v3202_v3 }
 0x226   : > { %v4603_v58 = vsel %vm891_vm15, 1.0, %v3202_v3  ;;  %v4609_v36 = vsel %vm892_vm10, 1.0, %v3202_v3  ;;  %v4611_v61 = vadd.s32 256, %v1422_v31  ;;  %vm893_vm13 = vcmp.eq.s32.totalorder %v3508_v54, %v4574_v46 }
 0x227   : > { %2190 = vmatmul.mubr.f32.gmra.mxu0 %v1985_v43  ;;  %v1987_v51 = vadd.f32 %v2774_v39, %v1683_v48  ;;  %vm894_vm14 = vcmp.eq.s32.totalorder %v3514_v55, %v4574_v46  ;;  %vm895_vm15 = vcmp.eq.s32.totalorder %v3511_v37, %v4574_v46  ;;  %vm1194_vm0 = vcmp.eq.s32.totalorder %v3514_v55, %v4583_v45 }
 0x228   : > { %v2649_v63 = vsel %vm1190_vm6, 1.0, %v3202_v3  ;;  %vm1494_vm1 = vcmp.eq.s32.totalorder %v3514_v55, %v4525_v27  ;;  %vm1798_vm2 = vcmp.eq.s32.totalorder %v3514_v55, %v1742_v49  ;;  %v2651_v60 = vsel %vm1192_vm11, 1.0, %v3202_v3 }
 0x229   : > { %2335 = vmatmul.mubr.f32.gmra.mxu1 %v1987_v51  ;;  %v1382_v0 = vadd.f32 %v2649_v63, %v4509_v12  ;;  %v2713_v2 = vsel %vm1494_vm1, 1.0, %v3202_v3  ;;  %v2777_v25 = vsel %vm1798_vm2, 1.0, %v3202_v3  ;;  %vm1193_vm4 = vcmp.eq.s32.totalorder %v3508_v54, %v4583_v45 }
 0x22a   : > { %v1384_v4 = vadd.f32 %v2651_v60, %v4521_v18  ;;  %vm1496_vm6 = vcmp.eq.s32.totalorder %v3517_v57, %v4525_v27  ;;  %vm1800_vm7 = vcmp.eq.s32.totalorder %v3517_v57, %v1742_v49  ;;  %v4641_v5 = vadd.s32 384, %v1726_v1 }
 0x22b   : > { %v1686_v8 = vadd.f32 %v2713_v2, %v1382_v0  ;;  %v2715_v11 = vsel %vm1496_vm6, 1.0, %v3202_v3  ;;  %v2779_v62 = vsel %vm1800_vm7, 1.0, %v3202_v3  ;;  %v2648_v13 = vsel %vm1189_vm3, 1.0, %v3202_v3 }
 0x22c   : > { %vm1195_vm5 = vcmp.eq.s32.totalorder %v3511_v37, %v4583_v45  ;;  %v1688_v9 = vadd.f32 %v2715_v11, %v1384_v4  ;;  %v1381_v6 = vadd.f32 %v2648_v13, %v4503_v14  ;;  %vm1493_vm8 = vcmp.eq.s32.totalorder %v3508_v54, %v4525_v27 }
 0x22d   : > { %vm1797_vm9 = vcmp.eq.s32.totalorder %v3508_v54, %v1742_v49  ;;  %v1990_v7 = vadd.f32 %v2777_v25, %v1686_v8  ;;  %v2712_v12 = vsel %vm1493_vm8, 1.0, %v3202_v3  ;;  %v2650_v21 = vsel %vm1191_vm12, 1.0, %v3202_v3 }
 0x22e   : > { %v2776_v18 = vsel %vm1797_vm9, 1.0, %v3202_v3  ;;  %v1992_v22 = vadd.f32 %v2779_v62, %v1688_v9  ;;  %v1685_v24 = vadd.f32 %v2712_v12, %v1381_v6  ;;  %v1383_v14 = vadd.f32 %v2650_v21, %v4515_v15 }
 0x22f   : > { %vm1495_vm3 = vcmp.eq.s32.totalorder %v3511_v37, %v4525_v27  ;;  %2194 = vmatprep.mubr.f32.mxu0 %v1990_v7  ;;  %vm1799_vm10 = vcmp.eq.s32.totalorder %v3511_v37, %v1742_v49  ;;  %v4666_v26 = vadd.s32 128, %v1120_v59  ;;  %v4668_v20 = vadd.s32 256, %v1424_v10 }
 0x230   : > { %v2714_v17 = vsel %vm1495_vm3, 1.0, %v3202_v3  ;;  %vm1196_vm12 = vcmp.eq.s32.totalorder %v3517_v57, %v4583_v45  ;;  %2339 = vmatprep.mubr.f32.mxu1 %v1992_v22  ;;  %v1989_v16 = vadd.f32 %v2776_v18, %v1685_v24  ;;  %v2778_v15 = vsel %vm1799_vm10, 1.0, %v3202_v3 }
 0x231   : > { %v1687_v19 = vadd.f32 %v2714_v17, %v1383_v14  ;;  %vm896_vm11 = vcmp.eq.s32.totalorder %v3517_v57, %v4574_v46  ;;  %v4679_v27 = vsel %vm893_vm13, 1.0, %v3202_v3  ;;  %v2593_v28 = vsel %vm894_vm14, 1.0, %v3202_v3 }
 0x232   : > { %v4689_v29 = vsel %vm895_vm15, 1.0, %v3202_v3  ;;  %v4691_v32 = vadd.s32 384, %v1728_v23  ;;  %2195 = vmatmul.mubr.f32.gmra.mxu0 %v1989_v16  ;;  %vm1198_vm1 = vcmp.eq.s32.totalorder %v3514_v55, %v4666_v26  ;;  %vm1200_vm13 = vcmp.eq.s32.totalorder %v3517_v57, %v4666_v26 }
 0x233   : > { %v1991_v34 = vadd.f32 %v2778_v15, %v1687_v19  ;;  %vm1502_vm2 = vcmp.eq.s32.totalorder %v3514_v55, %v4668_v20  ;;  %vm1197_vm14 = vcmp.eq.s32.totalorder %v3508_v54, %v4666_v26  ;;  %vm1199_vm15 = vcmp.eq.s32.totalorder %v3511_v37, %v4666_v26 }
 0x234   : > { %vm1501_vm6 = vcmp.eq.s32.totalorder %v3508_v54, %v4668_v20  ;;  %vm1504_vm7 = vcmp.eq.s32.totalorder %v3517_v57, %v4668_v20  ;;  %v2653_v40 = vsel %vm1194_vm0, 1.0, %v3202_v3  ;;  %vm1498_vm8 = vcmp.eq.s32.totalorder %v3514_v55, %v4611_v61 }
 0x235   : > { %vm1802_vm9 = vcmp.eq.s32.totalorder %v3514_v55, %v4641_v5  ;;  %2340 = vmatmul.mubr.f32.gmra.mxu1 %v1991_v34  ;;  %v1386_v35 = vadd.f32 %v2653_v40, %v4597_v56  ;;  %v2717_v31 = vsel %vm1498_vm8, 1.0, %v3202_v3  ;;  %v2655_v41 = vsel %vm1196_vm12, 1.0, %v3202_v3 }
 0x236   : > { %v2781_v38 = vsel %vm1802_vm9, 1.0, %v3202_v3  ;;  %v1388_v30 = vadd.f32 %v2655_v41, %v4609_v36  ;;  %vm1500_vm0 = vcmp.eq.s32.totalorder %v3517_v57, %v4611_v61  ;;  %vm1804_vm3 = vcmp.eq.s32.totalorder %v3517_v57, %v4641_v5 }
 0x237   : > { %v2652_v33 = vsel %vm1193_vm4, 1.0, %v3202_v3  ;;  %v1690_v44 = vadd.f32 %v2717_v31, %v1386_v35  ;;  %v2719_v47 = vsel %vm1500_vm0, 1.0, %v3202_v3  ;;  %v2783_v42 = vsel %vm1804_vm3, 1.0, %v3202_v3 }
 0x238   : > { %v1385_v53 = vadd.f32 %v2652_v33, %v4591_v50  ;;  %v1692_v52 = vadd.f32 %v2719_v47, %v1388_v30  ;;  %vm1497_vm10 = vcmp.eq.s32.totalorder %v3508_v54, %v4611_v61  ;;  %vm1801_vm12 = vcmp.eq.s32.totalorder %v3508_v54, %v4641_v5 }
 0x239   : > { %v2654_v49 = vsel %vm1195_vm5, 1.0, %v3202_v3  ;;  %v1994_v39 = vadd.f32 %v2781_v38, %v1690_v44  ;;  %v2716_v43 = vsel %vm1497_vm10, 1.0, %v3202_v3  ;;  %v2780_v48 = vsel %vm1801_vm12, 1.0, %v3202_v3 }
 0x23a   : > { %v1387_v56 = vadd.f32 %v2654_v49, %v4603_v58  ;;  %v1996_v50 = vadd.f32 %v2783_v42, %v1692_v52  ;;  %v1689_v36 = vadd.f32 %v2716_v43, %v1385_v53  ;;  %vm1499_vm4 = vcmp.eq.s32.totalorder %v3511_v37, %v4611_v61 }
 0x23b   : > { %vm1803_vm8 = vcmp.eq.s32.totalorder %v3511_v37, %v4641_v5  ;;  %2199 = vmatprep.mubr.f32.mxu0 %v1994_v39  ;;  %v2718_v1 = vsel %vm1499_vm4, 1.0, %v3202_v3  ;;  %v2657_v51 = vsel %vm1198_vm1, 1.0, %v3202_v3  ;;  %v2721_v58 = vsel %vm1502_vm2, 1.0, %v3202_v3 }
 0x23c   : > { %v2782_v45 = vsel %vm1803_vm8, 1.0, %v3202_v3  ;;  %2344 = vmatprep.mubr.f32.mxu1 %v1996_v50  ;;  %v1993_v61 = vadd.f32 %v2780_v48, %v1689_v36  ;;  %v1691_v63 = vadd.f32 %v2718_v1, %v1387_v56  ;;  %v1390_v59 = vadd.f32 %v2657_v51, %v2593_v28 }
 0x23d   : > { %vm1806_vm5 = vcmp.eq.s32.totalorder %v3514_v55, %v4691_v32  ;;  %v2595_v0 = vsel %vm896_vm11, 1.0, %v3202_v3  ;;  %vm1503_vm1 = vcmp.eq.s32.totalorder %v3511_v37, %v4668_v20  ;;  %v2659_v2 = vsel %vm1200_vm13, 1.0, %v3202_v3 }
 0x23e   : > { %v2723_v25 = vsel %vm1504_vm7, 1.0, %v3202_v3  ;;  %2200 = vmatmul.mubr.f32.gmra.mxu0 %v1993_v61  ;;  %v1995_v55 = vadd.f32 %v2782_v45, %v1691_v63  ;;  %v1694_v60 = vadd.f32 %v2721_v58, %v1390_v59  ;;  %v1392_v4 = vadd.f32 %v2659_v2, %v2595_v0 }
 0x23f   : > { %vm1808_vm11 = vcmp.eq.s32.totalorder %v3517_v57, %v4691_v32  ;;  %v2785_v46 = vsel %vm1806_vm5, 1.0, %v3202_v3  ;;  %v2656_v5 = vsel %vm1197_vm14, 1.0, %v3202_v3  ;;  %v2720_v8 = vsel %vm1501_vm6, 1.0, %v3202_v3 }
 0x240   : > { %v2658_v11 = vsel %vm1199_vm15, 1.0, %v3202_v3  ;;  %2345 = vmatmul.mubr.f32.gmra.mxu1 %v1995_v55  ;;  %v1998_v62 = vadd.f32 %v2785_v46, %v1694_v60  ;;  %v1696_v57 = vadd.f32 %v2723_v25, %v1392_v4  ;;  %v1389_v13 = vadd.f32 %v2656_v5, %v4679_v27 }
 0x241   : > { %vm1805_vm13 = vcmp.eq.s32.totalorder %v3508_v54, %v4691_v32  ;;  %v2787_v9 = vsel %vm1808_vm11, 1.0, %v3202_v3  ;;  %v1391_v6 = vadd.f32 %v2658_v11, %v4689_v29  ;;  %v2722_v10 = vsel %vm1503_vm1, 1.0, %v3202_v3 }
 0x242   : > { %vm1807_vm2 = vcmp.eq.s32.totalorder %v3511_v37, %v4691_v32  ;;  %2204 = vmatprep.mubr.f32.mxu0 %v1998_v62  ;;  %v2000_v7 = vadd.f32 %v2787_v9, %v1696_v57  ;;  %v1693_v12 = vadd.f32 %v2720_v8, %v1389_v13  ;;  %v2784_v18 = vsel %vm1805_vm13, 1.0, %v3202_v3 }
 0x243   : > { %v1695_v54 = vadd.f32 %v2722_v10, %v1391_v6  ;;  %v2786_v22 = vsel %vm1807_vm2, 1.0, %v3202_v3 }
 0x244   : > { %2349 = vmatprep.mubr.f32.mxu1 %v2000_v7  ;;  %v1997_v21 = vadd.f32 %v2784_v18, %v1693_v12 }
 0x245   : > { %v1999_v24 = vadd.f32 %v2786_v22, %v1695_v54 }
 0x246   : > { %2205 = vmatmul.mubr.f32.gmra.mxu0 %v1997_v21 }
 0x247   : > { %2350 = vmatmul.mubr.f32.gmra.mxu1 %v1999_v24 }
 0x259   : > { %v2826_v14 = vpop.f32.mrf.mxu0 }
 0x25b   : > { %v2906_v23 = vpop.f32.mrf.mxu1  ;;  %v2827_v17 = vpop.f32.mrf.mxu0 }
 0x25c   : > { %v2828_v26 = vadd.f32 %v2827_v17, %v2826_v14 }
 0x25d   : > { %v2907_v37 = vpop.f32.mrf.mxu1 }
 0x25e   : > { %v2908_v20 = vadd.f32 %v2907_v37, %v2906_v23 }
 0x260   : > { %v2277_v16 = vadd.f32 %v2908_v20, %v2828_v26 }
 0x262   : > { %2355 = vst [vmem:[%s4806_s7] sm:$0xff] %v2277_v16 }
 0x264   : > { %v2829_v3 = vpop.f32.mrf.mxu0 }
 0x266   : > { %v2909_v19 = vpop.f32.mrf.mxu1  ;;  %v2830_v15 = vpop.f32.mrf.mxu0 }
 0x267   : > { %v2831_v27 = vadd.f32 %v2830_v15, %v2829_v3 }
 0x268   : > { %v2910_v28 = vpop.f32.mrf.mxu1 }
 0x269   : > { %v2911_v29 = vadd.f32 %v2910_v28, %v2909_v19 }
 0x26b   : > { %v2282_v32 = vadd.f32 %v2911_v29, %v2831_v27 }
 0x26d   : > { %2356 = vst [vmem:[%s4806_s7 + $0x8] sm:$0xff] %v2282_v32 }
 0x270   : > { %v2832_v34 = vpop.f32.mrf.mxu0 }
 0x272   : > { %v2912_v40 = vpop.f32.mrf.mxu1  ;;  %v2833_v35 = vpop.f32.mrf.mxu0 }
 0x273   : > { %v2834_v31 = vadd.f32 %v2833_v35, %v2832_v34 }
 0x274   : > { %v2913_v38 = vpop.f32.mrf.mxu1 }
 0x275   : > { %v2914_v41 = vadd.f32 %v2913_v38, %v2912_v40 }
 0x277   : > { %v2287_v30 = vadd.f32 %v2914_v41, %v2834_v31 }
 0x279   : > { %2357 = vst [vmem:[%s4806_s7 + $0x10] sm:$0xff] %v2287_v30 }
 0x27c   : > { %v2835_v33 = vpop.f32.mrf.mxu0 }
 0x27e   : > { %v2915_v44 = vpop.f32.mrf.mxu1  ;;  %v2836_v47 = vpop.f32.mrf.mxu0 }
 0x27f   : > { %v2837_v42 = vadd.f32 %v2836_v47, %v2835_v33 }
 0x280   : > { %v2916_v53 = vpop.f32.mrf.mxu1 }
 0x281   : > { %v2917_v52 = vadd.f32 %v2916_v53, %v2915_v44 }
 0x283   : > { %v2292_v49 = vadd.f32 %v2917_v52, %v2837_v42 }
 0x285   : > { %2358 = vst [vmem:[%s4806_s7 + $0x18] sm:$0xff] %v2292_v49 }
 0x288   : > { %v2838_v39 = vpop.f32.mrf.mxu0 }
 0x28a   : > { %v2918_v43 = vpop.f32.mrf.mxu1  ;;  %v2839_v48 = vpop.f32.mrf.mxu0 }
 0x28b   : > { %v2840_v56 = vadd.f32 %v2839_v48, %v2838_v39 }
 0x28c   : > { %v2919_v50 = vpop.f32.mrf.mxu1 }
 0x28d   : > { %v2920_v36 = vadd.f32 %v2919_v50, %v2918_v43 }
 0x28f   : > { %v2297_v1 = vadd.f32 %v2920_v36, %v2840_v56 }
 0x291   : > { %2359 = vst [vmem:[%s4806_s7 + $0x20] sm:$0xff] %v2297_v1 }
 0x293   : > { %v2841_v45 = vpop.f32.mrf.mxu0 }
 0x295   : > { %v2921_v51 = vpop.f32.mrf.mxu1  ;;  %v2842_v58 = vpop.f32.mrf.mxu0 }
 0x296   : > { %v2843_v61 = vadd.f32 %v2842_v58, %v2841_v45 }
 0x297   : > { %v2922_v63 = vpop.f32.mrf.mxu1 }
 0x298   : > { %v2923_v59 = vadd.f32 %v2922_v63, %v2921_v51 }
 0x29a   : > { %v2302_v0 = vadd.f32 %v2923_v59, %v2843_v61 }
 0x29c   : > { %2360 = vst [vmem:[%s4806_s7 + $0x28] sm:$0xff] %v2302_v0 }
 0x29f   : > { %v2844_v2 = vpop.f32.mrf.mxu0 }
 0x2a1   : > { %v2845_v55 = vpop.f32.mrf.mxu0 }
 0x2a2   : > { %v2924_v25 = vpop.f32.mrf.mxu1  ;;  %v2846_v60 = vadd.f32 %v2845_v55, %v2844_v2 }
 0x2a4   : > { %v2925_v4 = vpop.f32.mrf.mxu1 }
 0x2a5   : > { %v2926_v46 = vadd.f32 %v2925_v4, %v2924_v25 }
 0x2a7   : > { %v2307_v5 = vadd.f32 %v2926_v46, %v2846_v60 }
 0x2a9   : > { %2361 = vst [vmem:[%s4806_s7 + $0x30] sm:$0xff] %v2307_v5 }
 0x2ab   : > { %v2847_v8 = vpop.f32.mrf.mxu0 }
 0x2ad   : > { %v2848_v62 = vpop.f32.mrf.mxu0 }
 0x2ae   : > { %v2927_v11 = vpop.f32.mrf.mxu1  ;;  %v2849_v57 = vadd.f32 %v2848_v62, %v2847_v8 }
 0x2b0   : > { %v2928_v13 = vpop.f32.mrf.mxu1 }
 0x2b1   : > { %v2929_v9 = vadd.f32 %v2928_v13, %v2927_v11 }
 0x2b3   : > { %v2312_v6 = vadd.f32 %v2929_v9, %v2849_v57 }
 0x2b5   : > { %2362 = vst [vmem:[%s4806_s7 + $0x38] sm:$0xff] %v2312_v6 }
 0x2b7   : > { %v2850_v10 = vpop.f32.mrf.mxu0 }
 0x2b9   : > { %v2851_v12 = vpop.f32.mrf.mxu0 }
 0x2ba   : > { %v2930_v7 = vpop.f32.mrf.mxu1  ;;  %v2852_v18 = vadd.f32 %v2851_v12, %v2850_v10 }
 0x2bc   : > { %v2931_v54 = vpop.f32.mrf.mxu1 }
 0x2bd   : > { %v2932_v21 = vadd.f32 %v2931_v54, %v2930_v7 }
 0x2bf   : > { %v2317_v22 = vadd.f32 %v2932_v21, %v2852_v18 }
 0x2c1   : > { %2363 = vst [vmem:[%s4806_s7 + $0x40] sm:$0xff] %v2317_v22 }
 0x2c3   : > { %v2853_v24 = vpop.f32.mrf.mxu0 }
 0x2c5   : > { %v2933_v14 = vpop.f32.mrf.mxu1  ;;  %v2854_v23 = vpop.f32.mrf.mxu0 }
 0x2c6   : > { %v2855_v17 = vadd.f32 %v2854_v23, %v2853_v24 }
 0x2c7   : > { %v2934_v26 = vpop.f32.mrf.mxu1 }
 0x2c8   : > { %v2935_v37 = vadd.f32 %v2934_v26, %v2933_v14 }
 0x2ca   : > { %v2322_v20 = vadd.f32 %v2935_v37, %v2855_v17 }
 0x2cc   : > { %2364 = vst [vmem:[%s4806_s7 + $0x48] sm:$0xff] %v2322_v20 }
 0x2cf   : > { %v2856_v16 = vpop.f32.mrf.mxu0 }
 0x2d1   : > { %v2936_v3 = vpop.f32.mrf.mxu1  ;;  %v2857_v19 = vpop.f32.mrf.mxu0 }
 0x2d2   : > { %v2858_v15 = vadd.f32 %v2857_v19, %v2856_v16 }
 0x2d3   : > { %v2937_v27 = vpop.f32.mrf.mxu1 }
 0x2d4   : > { %v2938_v28 = vadd.f32 %v2937_v27, %v2936_v3 }
 0x2d6   : > { %v2327_v29 = vadd.f32 %v2938_v28, %v2858_v15 }
 0x2d8   : > { %2365 = vst [vmem:[%s4806_s7 + $0x50] sm:$0xff] %v2327_v29 }
 0x2db   : > { %v2859_v32 = vpop.f32.mrf.mxu0 }
 0x2dd   : > { %v2939_v34 = vpop.f32.mrf.mxu1  ;;  %v2860_v40 = vpop.f32.mrf.mxu0 }
 0x2de   : > { %v2861_v35 = vadd.f32 %v2860_v40, %v2859_v32 }
 0x2df   : > { %v2940_v31 = vpop.f32.mrf.mxu1 }
 0x2e0   : > { %v2941_v38 = vadd.f32 %v2940_v31, %v2939_v34 }
 0x2e2   : > { %v2332_v41 = vadd.f32 %v2941_v38, %v2861_v35 }
 0x2e4   : > { %2366 = vst [vmem:[%s4806_s7 + $0x58] sm:$0xff] %v2332_v41 }
 0x2e7   : > { %v2862_v30 = vpop.f32.mrf.mxu0 }
 0x2e9   : > { %v2942_v33 = vpop.f32.mrf.mxu1  ;;  %v2863_v44 = vpop.f32.mrf.mxu0 }
 0x2ea   : > { %v2864_v47 = vadd.f32 %v2863_v44, %v2862_v30 }
 0x2eb   : > { %v2943_v42 = vpop.f32.mrf.mxu1 }
 0x2ec   : > { %v2944_v53 = vadd.f32 %v2943_v42, %v2942_v33 }
 0x2ee   : > { %v2337_v52 = vadd.f32 %v2944_v53, %v2864_v47 }
 0x2f0   : > { %2367 = vst [vmem:[%s4806_s7 + $0x60] sm:$0xff] %v2337_v52 }
 0x2f2   : > { %v2865_v49 = vpop.f32.mrf.mxu0 }
 0x2f4   : > { %v2866_v43 = vpop.f32.mrf.mxu0 }
 0x2f5   : > { %v2945_v39 = vpop.f32.mrf.mxu1  ;;  %v2867_v48 = vadd.f32 %v2866_v43, %v2865_v49 }
 0x2f7   : > { %v2946_v56 = vpop.f32.mrf.mxu1 }
 0x2f8   : > { %v2947_v50 = vadd.f32 %v2946_v56, %v2945_v39 }
 0x2fa   : > { %v2342_v36 = vadd.f32 %v2947_v50, %v2867_v48 }
 0x2fc   : > { %2368 = vst [vmem:[%s4806_s7 + $0x68] sm:$0xff] %v2342_v36 }
 0x2fe   : > { %v2868_v1 = vpop.f32.mrf.mxu0 }
 0x300   : > { %v2948_v45 = vpop.f32.mrf.mxu1  ;;  %v2869_v51 = vpop.f32.mrf.mxu0 }
 0x301   : > { %v2870_v58 = vadd.f32 %v2869_v51, %v2868_v1 }
 0x302   : > { %v2949_v61 = vpop.f32.mrf.mxu1 }
 0x303   : > { %v2950_v63 = vadd.f32 %v2949_v61, %v2948_v45 }
 0x305   : > { %v2347_v59 = vadd.f32 %v2950_v63, %v2870_v58 }
 0x306   : > { %v2871_v0 = vpop.f32.mrf.mxu0 }
 0x307   : > { %2369 = vst [vmem:[%s4806_s7 + $0x70] sm:$0xff] %v2347_v59  ;;  %v2951_v2 = vpop.f32.mrf.mxu1 }
 0x308   : > { %v2872_v25 = vpop.f32.mrf.mxu0 }
 0x309   : > { %v2873_v55 = vadd.f32 %v2872_v25, %v2871_v0  ;;  %v2952_v60 = vpop.f32.mrf.mxu1 }
 0x30a   : > { %v2953_v4 = vadd.f32 %v2952_v60, %v2951_v2 }
 0x30c   : > { %v2352_v46 = vadd.f32 %v2953_v4, %v2873_v55 }
 0x30e   : > { %2370 = vst [vmem:[%s4806_s7 + $0x78] sm:$0xff] %v2352_v46 }
 0x30f   : > { %3113 = shalt.err (!%p3110_p6)
}
 0x310   : > { %s3114_s12 = scalar_lea.hbm %s4829_s19, 2048  ;;  %s3118_s13 = scalar_lea.hbm %s4891_s4, 8192 }
 0x311   : > { %p3115_p7 = scmp.ne.s32.totalorder %s4829_s19, %s3114_s12  ;;  %p3119_p13 = scmp.lt.s32.totalorder %s4829_s19, %s4891_s4 }
 0x312   : > { %p3120_p10 = scmp.lt.s32.totalorder %s3118_s13, %s3114_s12 }
 0x313   : > { %p3116_p9 = pnand %p3115_p7, %p3283_p3 }
 0x314   : > { %p3121_p12 = por %p3120_p10, %p3119_p13 }
 0x315   : > { %p3117_p11 = pneg %p3116_p9 }
 0x317   : > { %p3122_p0 = pnand %p3121_p12, %p3117_p11 }
 0x319   : > { %3125 = shalt.err (!%p3122_p0)
}
 0x31a   : > { %s3204_s24 = smov 128   ;;  %s3205_s27 = smov 8  }
 0x31b   : > { %2958 = dma.vmem_to_hbm [thread:$0]  (%p3283_p3), %s4831_s8, 2048, %s4829_s19, %s4836_s28, %s3204_s24, %s3204_s24, %s3205_s27  }
 0x31c PF: > { %p2970_p1 = scmp.ge.s32.totalorder %s3196_s22, 2  ;;  %s2402_s5 = sand.u32 1, %s3168_s15  }
 0x31d   : > { %s2403_s10 = scalar_lea.sflag [#allocation4], %s2402_s5 }
 0x31e   : > { %p2965_p2 = pnand %p2970_p1, %p3292_p8 }
 0x320   : > { %p2966_p4 = pneg %p2965_p2 }
 0x322   : > { %3163 = dma.done.wait (%p2966_p4), %s2403_s10, 2048  }
 0x323   : > { %3165 = vsyncadd (%p2966_p4), %s2403_s10, 4294965248  ;;  %s18_s22 = sadd.s32 1, %s3196_s22   ;;  %s4897_s15 = smov %s3172_s16 }
 0x324   : > { %p15_p5 = scmp.ge.s32.totalorder %s18_s22, 6   ;;  %s4898_s16 = smov %s3176_s17 }
 0x325   : > { %s4899_s17 = smov %s3310_s9  ;;  %s4900_s18 = smov %s3188_s20 }
 0x326   : > { %s4901_s19 = smov %s3192_s21  ;;  %s4902_s20 = smov %s4905_s25 }
 0x327   : > { %s4903_s21 = smov %s4909_s26  ;;  %17 = sbr.rel (!%p15_p5) target bundleno = 6 (0x6), region = 76 }
 0x32c   :  { %2408 = vsyncpa [#allocation3], 1 }
 0x32d   :  { %2410 = vsyncpa [#allocation3 + $0x1], 1 }
 0x32e   :  { %2411 = vsyncpa [#allocation4], 1 }
 0x32f   :  { %2413 = vsyncpa [#allocation4 + $0x1], 1 }

</bundles_post_ra>
